<compile_context>
chip_gen: v6e
topology: v6e:2x2x1
jax: 0.10.0
libtpu: 0.0.40
codegen_flags: <defaults>
</compile_context>

<pallas_src>
import functools

import jax
import jax.numpy as jnp
import numpy as np
from jax.experimental import pallas as pl
from jax.experimental.pallas import tpu as pltpu

NUM_HEADS = 10   # hard-coded default in TransformerEncoderBlock
LN_EPS = 1e-5    # PyTorch nn.LayerNorm default eps
LANE = 128


def _round_up(v, m):
    return (v + m - 1) // m * m


# ----------------------------- in-kernel math ------------------------------ #

def _erf(x):
    # Abramowitz & Stegun 7.1.26 polynomial (|err| < 1.5e-7); VPU/EUP-only ops.
    a1, a2, a3, a4, a5 = 0.254829592, -0.284496736, 1.421413741, -1.453152027, 1.061405429
    p = 0.3275911
    sgn = jnp.where(x >= 0.0, 1.0, -1.0)
    ax = jnp.abs(x)
    t = 1.0 / (1.0 + p * ax)
    poly = ((((a5 * t + a4) * t + a3) * t + a2) * t + a1) * t
    return sgn * (1.0 - poly * jnp.exp(-ax * ax))


def _gelu(x):
    # exact (erf-based) GELU, matching torch.nn.GELU() default
    return 0.5 * x * (1.0 + _erf(x * 0.7071067811865476))


def _layernorm(x, w, b, lane_mask, e_real):
    # x: (rows, Ep) with padded lanes exactly 0; statistics over the real E only.
    inv_e = 1.0 / float(e_real)
    mu = jnp.sum(x, axis=-1, keepdims=True) * inv_e
    xc = (x - mu) * lane_mask                        # padded lanes forced back to 0
    var = jnp.sum(xc * xc, axis=-1, keepdims=True) * inv_e
    return xc * jax.lax.rsqrt(var + LN_EPS) * w + b  # w, b zero-padded -> pads stay 0


def _mm(a, b, dtype):      # a @ b, MXU operands cast to `dtype`, f32 accumulation
    return jax.lax.dot_general(a.astype(dtype), b.astype(dtype),
                               (((1,), (0,)), ((), ())),
                               preferred_element_type=jnp.float32)


def _mm_tn(a, b, dtype):   # a^T @ b   (contract dim 0 of both)
    return jax.lax.dot_general(a.astype(dtype), b.astype(dtype),
                               (((0,), (0,)), ((), ())),
                               preferred_element_type=jnp.float32)


def _mm_nt(a, b, dtype):   # a @ b^T   (contract dim 1 of both)
    return jax.lax.dot_general(a.astype(dtype), b.astype(dtype),
                               (((1,), (1,)), ((), ())),
                               preferred_element_type=jnp.float32)


# ------------------------------- the kernel -------------------------------- #

def _encoder_stack_kernel(x_ref, head_bias_ref, vecs_ref, bqkv_ref, b1_ref,
                          wqkv_ref, wo_ref, w1_ref, w2_ref,
                          o_ref,
                          qkv_scr, ctx_scr,
                          *, num_heads, emb_real, mxu_dtype):
    BT, N, Ep = o_ref.shape
    rows = BT * N
    D = emb_real // num_heads
    inv_scale = 1.0 / (float(D) ** 0.5)
    layer = pl.program_id(1)

    # Layer 0: the (pipelined, prefetched) input block becomes the resident carry.
    @pl.when(layer == 0)
    def _():
        o_ref[...] = x_ref[...]

    x = o_ref[...].reshape(rows, Ep).astype(jnp.float32)

    # Lane mask over the padded embedding columns (1 for real, 0 for pad).
    lane = jax.lax.broadcasted_iota(jnp.int32, (1, Ep), 1)
    lane_mask = (lane < emb_real).astype(jnp.float32)

    # Packed per-layer vectors: [ln1_w, ln1_b, b_out, ln2_w, ln2_b, b_ff2]
    ln1w = vecs_ref[0, 0:1, :]
    ln1b = vecs_ref[0, 1:2, :]
    bo = vecs_ref[0, 2:3, :]
    ln2w = vecs_ref[0, 3:4, :]
    ln2b = vecs_ref[0, 4:5, :]
    b2 = vecs_ref[0, 5:6, :]

    # --- norm1 + fused QKV projection (one wide matmul) ---
    xn = _layernorm(x, ln1w, ln1b, lane_mask, emb_real)
    qkv_scr[...] = _mm(xn, wqkv_ref[0], mxu_dtype) + bqkv_ref[0]

    # --- per-batch-row attention; ctx written into a VMEM scratch slice ---
    @pl.loop(0, BT)
    def _(bt):
        r0 = pl.multiple_of(bt * N, N)
        qb = qkv_scr[pl.ds(r0, N), 0:Ep]
        kb = qkv_scr[pl.ds(r0, N), Ep:2 * Ep]
        vb = qkv_scr[pl.ds(r0, N), 2 * Ep:3 * Ep]
        # einsum('nq,nk->qk') over the sequence axis, all heads at once; the
        # precomputed additive bias (0 / -1e30) keeps each head block-diagonal.
        logits = _mm_tn(qb, kb, mxu_dtype) * inv_scale + head_bias_ref[...]
        logits = logits - jnp.max(logits, axis=-1, keepdims=True)
        e = jnp.exp(logits)                                      # f32: off-head -> 0
        attn = e * pl.reciprocal(jnp.sum(e, axis=-1, keepdims=True), approx=False)
        # einsum('qk,nk->nq'): apply attention.
        ctx_scr[pl.ds(r0, N), :] = _mm_nt(vb, attn, mxu_dtype)

    mha = _mm(ctx_scr[...], wo_ref[0], mxu_dtype) + bo
    x2 = xn + mha                                                # residual on normed x

    # --- norm2 + feed-forward + residual ---
    x3 = _layernorm(x2, ln2w, ln2b, lane_mask, emb_real)
    h1 = _gelu(_mm(x3, w1_ref[0], mxu_dtype) + b1_ref[0])
    ff = _mm(h1, w2_ref[0], mxu_dtype) + b2
    x4 = x3 + ff

    o_ref[...] = x4.reshape(BT, N, Ep).astype(o_ref.dtype)       # lane-dense store


# --------------------------- VMEM budget / tiling --------------------------- #

def _vmem_estimate(bt, N, Ep, Hp, w_itemsize):
    rows = bt * N
    per_layer_w = w_itemsize * (4 * Ep * Ep + 2 * Ep * Hp) + 4 * (9 * Ep + Hp)
    blocks = (2 * per_layer_w            # double-buffered per-layer weight blocks
              + 4 * 4 * rows * Ep        # x input + output carry blocks
              + 2 * 4 * Ep * Ep)         # resident head-bias block
    scratch = 4 * rows * 4 * Ep          # qkv + ctx VMEM scratch
    live = 4 * (rows * (6 * Ep + Hp) + 3 * Ep * Ep)   # f32 activations + attn temps
    return blocks + scratch + live


def _choose_batch_tile(B, N, Ep, Hp, w_itemsize, budget):
    best = 1
    for bt in range(1, B + 1):
        if B % bt:
            continue
        if bt * N > 1024:                # enough rows; stop growing the tile
            break
        if _vmem_estimate(bt, N, Ep, Hp, w_itemsize) + (4 << 20) <= budget:
            best = bt
    # v7x megacore: keep >= 2 batch tiles once the MXU is already well fed.
    if B // best == 1:
        for bt in range(best - 1, 0, -1):
            if B % bt == 0 and bt * N >= 256:
                best = bt
                break
    return best


# ------------------------------ host wrapper -------------------------------- #

def transformer_module_forward(x, params, *, num_heads=NUM_HEADS,
                               mxu_dtype=jnp.float32, batch_tile=None):
    B, N, E = x.shape
    depth = params["ln1_w"].shape[0]
    hidden = params["w1"].shape[-1]
    assert E % num_heads == 0
    D = E // num_heads

    Ep = _round_up(E, LANE)
    Hp = _round_up(hidden, LANE)
    w_itemsize = jnp.dtype(mxu_dtype).itemsize

    # Per-generation VMEM budget (v7x: 64 MiB physical; v5e/v6e: 128 MiB).
    try:
        vmem_cap = int(pltpu.get_tpu_info().vmem_capacity_bytes)
    except Exception:
        vmem_cap = 64 * 2**20
    budget = (vmem_cap * 3) // 4

    if batch_tile is None:
        BT = _choose_batch_tile(B, N, Ep, Hp, w_itemsize, budget)
    else:
        BT = batch_tile
    assert B % BT == 0
    nb = B // BT

    # ----- pad / pack parameters (lane-dense, bf16 weights if requested) -----
    def pad2(a, r, c):
        return jnp.pad(a, ((0, 0), (0, r - a.shape[1]), (0, c - a.shape[2])))

    xp = jnp.pad(x, ((0, 0), (0, 0), (0, Ep - E)))

    wqkv = jnp.concatenate([pad2(params["wq"], Ep, Ep),
                            pad2(params["wk"], Ep, Ep),
                            pad2(params["wv"], Ep, Ep)], axis=-1).astype(mxu_dtype)
    bqkv = jnp.concatenate([pad2(params["bq"], 1, Ep),
                            pad2(params["bk"], 1, Ep),
                            pad2(params["bv"], 1, Ep)], axis=-1)          # f32
    wo_p = pad2(params["wo"], Ep, Ep).astype(mxu_dtype)
    w1_p = pad2(params["w1"], Ep, Hp).astype(mxu_dtype)
    w2_p = pad2(params["w2"], Hp, Ep).astype(mxu_dtype)
    b1_p = pad2(params["b1"], 1, Hp)                                       # f32
    vecs = jnp.concatenate([pad2(params["ln1_w"], 1, Ep),
                            pad2(params["ln1_b"], 1, Ep),
                            pad2(params["bo"], 1, Ep),
                            pad2(params["ln2_w"], 1, Ep),
                            pad2(params["ln2_b"], 1, Ep),
                            pad2(params["b2"], 1, Ep)], axis=1)            # (depth,6,Ep)

    # Precomputed additive head bias: 0 inside a head's DxD block, -1e30 outside.
    col = jnp.arange(Ep, dtype=jnp.int32)
    same_head = (col[:, None] // D) == (col[None, :] // D)
    head_bias = jnp.where(same_head, 0.0, -1e30).astype(jnp.float32)

    in_specs = [
        pl.BlockSpec((BT, N, Ep), lambda bi, l: (bi, 0, 0)),        # x (prefetched)
        pl.BlockSpec((Ep, Ep), lambda bi, l: (0, 0)),               # head bias (resident)
        pl.BlockSpec((1, 6, Ep), lambda bi, l: (l, 0, 0)),          # packed LN/bias vectors
        pl.BlockSpec((1, 1, 3 * Ep), lambda bi, l: (l, 0, 0)),      # qkv bias
        pl.BlockSpec((1, 1, Hp), lambda bi, l: (l, 0, 0)),          # ff bias 1
        pl.BlockSpec((1, Ep, 3 * Ep), lambda bi, l: (l, 0, 0)),     # fused Wqkv
        pl.BlockSpec((1, Ep, Ep), lambda bi, l: (l, 0, 0)),         # Wo
        pl.BlockSpec((1, Ep, Hp), lambda bi, l: (l, 0, 0)),         # W1
        pl.BlockSpec((1, Hp, Ep), lambda bi, l: (l, 0, 0)),         # W2
    ]
    args = (xp, head_bias, vecs, bqkv, b1_p, wqkv, wo_p, w1_p, w2_p)

    vmem_bytes = int(min(budget,
                         max(32 * 2**20,
                             _vmem_estimate(BT, N, Ep, Hp, w_itemsize) + (8 << 20))))

    kernel = functools.partial(_encoder_stack_kernel, num_heads=num_heads,
                               emb_real=E, mxu_dtype=mxu_dtype)
    outp = pl.pallas_call(
        kernel,
        out_shape=jax.ShapeDtypeStruct((B, N, Ep), x.dtype),
        grid_spec=pltpu.PrefetchScalarGridSpec(
            num_scalar_prefetch=0,
            grid=(nb, depth),
            in_specs=in_specs,
            out_specs=pl.BlockSpec((BT, N, Ep), lambda bi, l: (bi, 0, 0)),
            scratch_shapes=[pltpu.VMEM((BT * N, 3 * Ep), jnp.float32),   # qkv
                            pltpu.VMEM((BT * N, Ep), jnp.float32)]),     # ctx
        compiler_params=pltpu.CompilerParams(
            dimension_semantics=("parallel", "arbitrary"),
            vmem_limit_bytes=vmem_bytes),
    )(*args)
    return outp[:, :, :E]


# --------------------------- params & reference ----------------------------- #

def init_params(key, depth, emb, expansion=4):
    hidden = expansion * emb
    params = {
        "ln1_w": jnp.ones((depth, 1, emb), jnp.float32),
        "ln1_b": jnp.zeros((depth, 1, emb), jnp.float32),
        "ln2_w": jnp.ones((depth, 1, emb), jnp.float32),
        "ln2_b": jnp.zeros((depth, 1, emb), jnp.float32),
    }
    names = [("wq", emb, emb), ("wk", emb, emb), ("wv", emb, emb),
             ("wo", emb, emb), ("w1", emb, hidden), ("w2", hidden, emb)]
    keys = jax.random.split(key, 2 * len(names))
    for i, (name, din, dout) in enumerate(names):
        bound = 1.0 / (din ** 0.5)  # PyTorch nn.Linear default init range
        params[name] = jax.random.uniform(
            keys[2 * i], (depth, din, dout), jnp.float32, -bound, bound)
        params["b" + name[1:]] = jax.random.uniform(
            keys[2 * i + 1], (depth, 1, dout), jnp.float32, -bound, bound)
    return params


def reference_forward(x, params, *, num_heads=NUM_HEADS):
    B, N, E = x.shape
    depth = params["ln1_w"].shape[0]
    D = E // num_heads
    scale = D ** 0.5

    def ln(y, w, b):
        mu = jnp.mean(y, -1, keepdims=True)
        var = jnp.mean((y - mu) ** 2, -1, keepdims=True)
        return (y - mu) / jnp.sqrt(var + LN_EPS) * w + b

    for l in range(depth):
        xn = ln(x, params["ln1_w"][l, 0], params["ln1_b"][l, 0])
        q = (xn @ params["wq"][l] + params["bq"][l, 0]).reshape(B, N, num_heads, D)
        k = (xn @ params["wk"][l] + params["bk"][l, 0]).reshape(B, N, num_heads, D)
        v = (xn @ params["wv"][l] + params["bv"][l, 0]).reshape(B, N, num_heads, D)
        qk = jnp.einsum("bnhq,bnhk->bhqk", q, k) / scale
        attn = jax.nn.softmax(qk, axis=-1)
        w_avg = jnp.einsum("bhqk,bnhk->bnhq", attn, v).reshape(B, N, E)
        mo = w_avg @ params["wo"][l] + params["bo"][l, 0]
        x = xn + mo
        x3 = ln(x, params["ln2_w"][l, 0], params["ln2_b"][l, 0])
        h1 = x3 @ params["w1"][l] + params["b1"][l, 0]
        h1 = 0.5 * h1 * (1.0 + jax.scipy.special.erf(h1 / jnp.sqrt(2.0)))
        ff = h1 @ params["w2"][l] + params["b2"][l, 0]
        x = x3 + ff
    return x


# ---------------------------------- main ------------------------------------ #

if __name__ == "__main__":
    depth, emb = 2, 40          # emb must be divisible by the hard-coded 10 heads
    B, N = 2, 8

    key = jax.random.PRNGKey(0)
    kx, kp = jax.random.split(key)
    x = jax.random.normal(kx, (B, N, emb), jnp.float32)
    params = init_params(kp, depth, emb)

    ref = reference_forward(x, params)

    # Full-precision MXU path: strict tolerance.
    out_f32 = jax.block_until_ready(
        transformer_module_forward(x, params, mxu_dtype=jnp.float32))
    np.testing.assert_allclose(np.asarray(out_f32), np.asarray(ref),
                               rtol=2e-3, atol=2e-3)

    # bf16 weights / MXU operands (f32 accumulation): looser tolerance
    # (intentional — q/k are cast to bf16 before the sequence-axis contraction).
    out_bf16 = jax.block_until_ready(
        transformer_module_forward(x, params, mxu_dtype=jnp.bfloat16))
    np.testing.assert_allclose(np.asarray(out_bf16), np.asarray(ref),
                               rtol=5e-2, atol=5e-2)

    print("KERNEL_OK")
</pallas_src>

<mosaic_0001>
module attributes {stable_mosaic.version = 11 : i64} {
  func.func @_encoder_stack_kernel(%arg0: i32, %arg1: i32, %arg2: memref<2x8x128xf32, #tpu.memory_space<vmem>>, %arg3: memref<128x128xf32, #tpu.memory_space<vmem>>, %arg4: memref<1x6x128xf32, #tpu.memory_space<vmem>>, %arg5: memref<1x1x384xf32, #tpu.memory_space<vmem>>, %arg6: memref<1x1x256xf32, #tpu.memory_space<vmem>>, %arg7: memref<1x128x384xf32, #tpu.memory_space<vmem>>, %arg8: memref<1x128x128xf32, #tpu.memory_space<vmem>>, %arg9: memref<1x128x256xf32, #tpu.memory_space<vmem>>, %arg10: memref<1x256x128xf32, #tpu.memory_space<vmem>>, %arg11: memref<2x8x128xf32, #tpu.memory_space<vmem>>, %arg12: memref<16x384xf32, #tpu.memory_space<vmem>>, %arg13: memref<16x128xf32, #tpu.memory_space<vmem>>) attributes {dimension_semantics = [#tpu.dimension_semantics<parallel>, #tpu.dimension_semantics<arbitrary>], iteration_bounds = array<i64: 1, 2>, scalar_prefetch = 0 : i64, scratch_operands = 2 : i64, tpu.core_type = #tpu.core_type<tc>, window_params = [{transform_indices = @transform_0, window_bounds = array<i64: 2, 8, 128>}, {pipeline_mode = #tpu.pipeline_mode<synchronous>, transform_indices = @transform_1, window_bounds = array<i64: 128, 128>}, {transform_indices = @transform_2, window_bounds = array<i64: 1, 6, 128>}, {transform_indices = @transform_3, window_bounds = array<i64: 1, 1, 384>}, {transform_indices = @transform_4, window_bounds = array<i64: 1, 1, 256>}, {transform_indices = @transform_5, window_bounds = array<i64: 1, 128, 384>}, {transform_indices = @transform_6, window_bounds = array<i64: 1, 128, 128>}, {transform_indices = @transform_7, window_bounds = array<i64: 1, 128, 256>}, {transform_indices = @transform_8, window_bounds = array<i64: 1, 256, 128>}, {transform_indices = @transform_9, window_bounds = array<i64: 2, 8, 128>}]} {
    %c0_i32 = arith.constant 0 : i32
    %0 = arith.cmpi eq, %arg1, %c0_i32 : i32
    %1 = arith.extui %0 : i1 to i32
    %c0_i32_0 = arith.constant 0 : i32
    %2 = arith.cmpi ne, %1, %c0_i32_0 : i32
    scf.if %2 {
      %c0_72 = arith.constant 0 : index
      %c0_73 = arith.constant 0 : index
      %c0_74 = arith.constant 0 : index
      %138 = vector.load %arg2[%c0_72, %c0_73, %c0_74] : memref<2x8x128xf32, #tpu.memory_space<vmem>>, vector<2x8x128xf32>
      %c0_75 = arith.constant 0 : index
      %c0_76 = arith.constant 0 : index
      %c0_77 = arith.constant 0 : index
      %139 = vector.load %arg11[%c0_75, %c0_76, %c0_77] : memref<2x8x128xf32, #tpu.memory_space<vmem>>, vector<2x8x128xf32>
      tpu.vector_store %arg11[%c0_75, %c0_76, %c0_77], %138 {strides = array<i32>} : memref<2x8x128xf32, #tpu.memory_space<vmem>>, vector<2x8x128xf32>,
    } else {
    }
    %c0 = arith.constant 0 : index
    %c0_1 = arith.constant 0 : index
    %c0_2 = arith.constant 0 : index
    %3 = vector.load %arg11[%c0, %c0_1, %c0_2] : memref<2x8x128xf32, #tpu.memory_space<vmem>>, vector<2x8x128xf32>
    %4 = vector.shape_cast %3 : vector<2x8x128xf32> to vector<16x128xf32>
    %5 = tpu.iota {dimensions = array<i32: 1>} : vector<1x128xi32>
    %c40_i32 = arith.constant 40 : i32
    %6 = vector.broadcast %c40_i32 : i32 to vector<1x128xi32>
    %7 = arith.cmpi slt, %5, %6 : vector<1x128xi32>
    %8 = arith.extui %7 : vector<1x128xi1> to vector<1x128xi32>
    %9 = arith.sitofp %8 : vector<1x128xi32> to vector<1x128xf32>
    %c0_3 = arith.constant 0 : index
    %c0_4 = arith.constant 0 : index
    %c0_5 = arith.constant 0 : index
    %10 = vector.load %arg4[%c0_3, %c0_4, %c0_5] : memref<1x6x128xf32, #tpu.memory_space<vmem>>, vector<1x1x128xf32>
    %11 = vector.shape_cast %10 : vector<1x1x128xf32> to vector<1x128xf32>
    %c0_6 = arith.constant 0 : index
    %c1 = arith.constant 1 : index
    %c0_7 = arith.constant 0 : index
    %12 = vector.load %arg4[%c0_6, %c1, %c0_7] : memref<1x6x128xf32, #tpu.memory_space<vmem>>, vector<1x1x128xf32>
    %13 = vector.shape_cast %12 : vector<1x1x128xf32> to vector<1x128xf32>
    %c0_8 = arith.constant 0 : index
    %c2 = arith.constant 2 : index
    %c0_9 = arith.constant 0 : index
    %14 = vector.load %arg4[%c0_8, %c2, %c0_9] : memref<1x6x128xf32, #tpu.memory_space<vmem>>, vector<1x1x128xf32>
    %15 = vector.shape_cast %14 : vector<1x1x128xf32> to vector<1x128xf32>
    %c0_10 = arith.constant 0 : index
    %c3 = arith.constant 3 : index
    %c0_11 = arith.constant 0 : index
    %16 = vector.load %arg4[%c0_10, %c3, %c0_11] : memref<1x6x128xf32, #tpu.memory_space<vmem>>, vector<1x1x128xf32>
    %17 = vector.shape_cast %16 : vector<1x1x128xf32> to vector<1x128xf32>
    %c0_12 = arith.constant 0 : index
    %c4 = arith.constant 4 : index
    %c0_13 = arith.constant 0 : index
    %18 = vector.load %arg4[%c0_12, %c4, %c0_13] : memref<1x6x128xf32, #tpu.memory_space<vmem>>, vector<1x1x128xf32>
    %19 = vector.shape_cast %18 : vector<1x1x128xf32> to vector<1x128xf32>
    %c0_14 = arith.constant 0 : index
    %c5 = arith.constant 5 : index
    %c0_15 = arith.constant 0 : index
    %20 = vector.load %arg4[%c0_14, %c5, %c0_15] : memref<1x6x128xf32, #tpu.memory_space<vmem>>, vector<1x1x128xf32>
    %21 = vector.shape_cast %20 : vector<1x1x128xf32> to vector<1x128xf32>
    %cst = arith.constant dense<0.000000e+00> : vector<16xf32>
    %22 = vector.multi_reduction <add>, %4, %cst [1] : vector<16x128xf32> to vector<16xf32>
    %23 = vector.shape_cast %22 : vector<16xf32> to vector<16x1xf32>
    %cst_16 = arith.constant 2.500000e-02 : f32
    %24 = vector.broadcast %cst_16 : f32 to vector<16x1xf32>
    %25 = arith.mulf %23, %24 : vector<16x1xf32>
    %26 = vector.broadcast %25 : vector<16x1xf32> to vector<16x128xf32>
    %27 = arith.subf %4, %26 : vector<16x128xf32>
    %28 = vector.broadcast %9 : vector<1x128xf32> to vector<16x128xf32>
    %29 = arith.mulf %27, %28 : vector<16x128xf32>
    %30 = arith.mulf %29, %29 : vector<16x128xf32>
    %cst_17 = arith.constant dense<0.000000e+00> : vector<16xf32>
    %31 = vector.multi_reduction <add>, %30, %cst_17 [1] : vector<16x128xf32> to vector<16xf32>
    %32 = vector.shape_cast %31 : vector<16xf32> to vector<16x1xf32>
    %cst_18 = arith.constant 2.500000e-02 : f32
    %33 = vector.broadcast %cst_18 : f32 to vector<16x1xf32>
    %34 = arith.mulf %32, %33 : vector<16x1xf32>
    %cst_19 = arith.constant 9.99999974E-6 : f32
    %35 = vector.broadcast %cst_19 : f32 to vector<16x1xf32>
    %36 = arith.addf %34, %35 : vector<16x1xf32>
    %37 = math.rsqrt %36 : vector<16x1xf32>
    %38 = vector.broadcast %37 : vector<16x1xf32> to vector<16x128xf32>
    %39 = arith.mulf %29, %38 : vector<16x128xf32>
    %40 = vector.broadcast %11 : vector<1x128xf32> to vector<16x128xf32>
    %41 = arith.mulf %39, %40 : vector<16x128xf32>
    %42 = vector.broadcast %13 : vector<1x128xf32> to vector<16x128xf32>
    %43 = arith.addf %41, %42 : vector<16x128xf32>
    %c0_20 = arith.constant 0 : index
    %c0_21 = arith.constant 0 : index
    %c0_22 = arith.constant 0 : index
    %44 = vector.load %arg7[%c0_20, %c0_21, %c0_22] : memref<1x128x384xf32, #tpu.memory_space<vmem>>, vector<1x128x384xf32>
    %45 = vector.shape_cast %44 : vector<1x128x384xf32> to vector<128x384xf32>
    %cst_23 = arith.constant dense<0.000000e+00> : vector<16x384xf32>
    %46 = tpu.matmul %43, %45, %cst_23 {dimension_numbers = #tpu.dot_dimension_numbers<[1], [0], [0], [1], [0, 0, 1, 1], [], []>} : vector<16x128xf32>, vector<128x384xf32>, vector<16x384xf32> -> vector<16x384xf32>
    %c0_24 = arith.constant 0 : index
    %c0_25 = arith.constant 0 : index
    %c0_26 = arith.constant 0 : index
    %47 = vector.load %arg5[%c0_24, %c0_25, %c0_26] : memref<1x1x384xf32, #tpu.memory_space<vmem>>, vector<1x1x384xf32>
    %48 = vector.shape_cast %47 : vector<1x1x384xf32> to vector<1x384xf32>
    %49 = vector.broadcast %48 : vector<1x384xf32> to vector<16x384xf32>
    %50 = arith.addf %46, %49 : vector<16x384xf32>
    %c0_27 = arith.constant 0 : index
    %c0_28 = arith.constant 0 : index
    %51 = vector.load %arg12[%c0_27, %c0_28] : memref<16x384xf32, #tpu.memory_space<vmem>>, vector<16x384xf32>
    tpu.vector_store %arg12[%c0_27, %c0_28], %50 {strides = array<i32>} : memref<16x384xf32, #tpu.memory_space<vmem>>, vector<16x384xf32>,
    %c0_i32_29 = arith.constant 0 : i32
    %c2_i32 = arith.constant 2 : i32
    %52 = arith.addi %c0_i32_29, %c2_i32 : i32
    %c1_i32 = arith.constant 1 : i32
    scf.for %arg14 = %c0_i32_29 to %52 step %c1_i32  : i32 {
      %c1_i32_72 = arith.constant 1 : i32
      %138 = arith.muli %arg14, %c1_i32_72 : i32
      %c0_i32_73 = arith.constant 0 : i32
      %139 = arith.addi %c0_i32_73, %138 : i32
      %c8_i32 = arith.constant 8 : i32
      %140 = arith.muli %139, %c8_i32 : i32
      %141 = tpu.assume_multiple %140, 8 : i32
      %142 = arith.index_cast %141 : i32 to index
      %c0_74 = arith.constant 0 : index
      %143 = vector.load %arg12[%142, %c0_74] : memref<16x384xf32, #tpu.memory_space<vmem>>, vector<8x128xf32>
      %144 = arith.index_cast %141 : i32 to index
      %c128 = arith.constant 128 : index
      %145 = vector.load %arg12[%144, %c128] : memref<16x384xf32, #tpu.memory_space<vmem>>, vector<8x128xf32>
      %146 = arith.index_cast %141 : i32 to index
      %c256 = arith.constant 256 : index
      %147 = vector.load %arg12[%146, %c256] : memref<16x384xf32, #tpu.memory_space<vmem>>, vector<8x128xf32>
      %cst_75 = arith.constant dense<0.000000e+00> : vector<128x128xf32>
      %148 = tpu.matmul %143, %145, %cst_75 {dimension_numbers = #tpu.dot_dimension_numbers<[0], [0], [1], [1], [0, 1, 1, 1], [], []>} : vector<8x128xf32>, vector<8x128xf32>, vector<128x128xf32> -> vector<128x128xf32>
      %cst_76 = arith.constant 5.000000e-01 : f32
      %149 = vector.broadcast %cst_76 : f32 to vector<128x128xf32>
      %150 = arith.mulf %148, %149 : vector<128x128xf32>
      %c0_77 = arith.constant 0 : index
      %c0_78 = arith.constant 0 : index
      %151 = vector.load %arg3[%c0_77, %c0_78] : memref<128x128xf32, #tpu.memory_space<vmem>>, vector<128x128xf32>
      %152 = arith.addf %150, %151 : vector<128x128xf32>
      %cst_79 = arith.constant dense<0xFF800000> : vector<128xf32>
      %153 = vector.multi_reduction <maximumf>, %152, %cst_79 [1] : vector<128x128xf32> to vector<128xf32>
      %154 = vector.shape_cast %153 : vector<128xf32> to vector<128x1xf32>
      %155 = vector.broadcast %154 : vector<128x1xf32> to vector<128x128xf32>
      %156 = arith.subf %152, %155 : vector<128x128xf32>
      %157 = math.exp %156 : vector<128x128xf32>
      %cst_80 = arith.constant dense<0.000000e+00> : vector<128xf32>
      %158 = vector.multi_reduction <add>, %157, %cst_80 [1] : vector<128x128xf32> to vector<128xf32>
      %159 = vector.shape_cast %158 : vector<128xf32> to vector<128x1xf32>
      %160 = tpu.reciprocal %159 : vector<128x1xf32> -> vector<128x1xf32>
      %161 = vector.broadcast %160 : vector<128x1xf32> to vector<128x128xf32>
      %162 = arith.mulf %157, %161 : vector<128x128xf32>
      %cst_81 = arith.constant dense<0.000000e+00> : vector<8x128xf32>
      %163 = tpu.matmul %147, %162, %cst_81 {dimension_numbers = #tpu.dot_dimension_numbers<[1], [1], [0], [0], [0, 0, 1, 0], [], []>} : vector<8x128xf32>, vector<128x128xf32>, vector<8x128xf32> -> vector<8x128xf32>
      %164 = arith.index_cast %141 : i32 to index
      %c0_82 = arith.constant 0 : index
      %165 = vector.load %arg13[%164, %c0_82] : memref<16x128xf32, #tpu.memory_space<vmem>>, vector<8x128xf32>
      tpu.vector_store %arg13[%164, %c0_82], %163 {strides = array<i32>} : memref<16x128xf32, #tpu.memory_space<vmem>>, vector<8x128xf32>,
    }
    %c2_i32_30 = arith.constant 2 : i32
    %c0_31 = arith.constant 0 : index
    %c0_32 = arith.constant 0 : index
    %53 = vector.load %arg13[%c0_31, %c0_32] : memref<16x128xf32, #tpu.memory_space<vmem>>, vector<16x128xf32>
    %c0_33 = arith.constant 0 : index
    %c0_34 = arith.constant 0 : index
    %c0_35 = arith.constant 0 : index
    %54 = vector.load %arg8[%c0_33, %c0_34, %c0_35] : memref<1x128x128xf32, #tpu.memory_space<vmem>>, vector<1x128x128xf32>
    %55 = vector.shape_cast %54 : vector<1x128x128xf32> to vector<128x128xf32>
    %cst_36 = arith.constant dense<0.000000e+00> : vector<16x128xf32>
    %56 = tpu.matmul %53, %55, %cst_36 {dimension_numbers = #tpu.dot_dimension_numbers<[1], [0], [0], [1], [0, 0, 1, 1], [], []>} : vector<16x128xf32>, vector<128x128xf32>, vector<16x128xf32> -> vector<16x128xf32>
    %57 = vector.broadcast %15 : vector<1x128xf32> to vector<16x128xf32>
    %58 = arith.addf %56, %57 : vector<16x128xf32>
    %59 = arith.addf %43, %58 : vector<16x128xf32>
    %cst_37 = arith.constant dense<0.000000e+00> : vector<16xf32>
    %60 = vector.multi_reduction <add>, %59, %cst_37 [1] : vector<16x128xf32> to vector<16xf32>
    %61 = vector.shape_cast %60 : vector<16xf32> to vector<16x1xf32>
    %cst_38 = arith.constant 2.500000e-02 : f32
    %62 = vector.broadcast %cst_38 : f32 to vector<16x1xf32>
    %63 = arith.mulf %61, %62 : vector<16x1xf32>
    %64 = vector.broadcast %63 : vector<16x1xf32> to vector<16x128xf32>
    %65 = arith.subf %59, %64 : vector<16x128xf32>
    %66 = vector.broadcast %9 : vector<1x128xf32> to vector<16x128xf32>
    %67 = arith.mulf %65, %66 : vector<16x128xf32>
    %68 = arith.mulf %67, %67 : vector<16x128xf32>
    %cst_39 = arith.constant dense<0.000000e+00> : vector<16xf32>
    %69 = vector.multi_reduction <add>, %68, %cst_39 [1] : vector<16x128xf32> to vector<16xf32>
    %70 = vector.shape_cast %69 : vector<16xf32> to vector<16x1xf32>
    %cst_40 = arith.constant 2.500000e-02 : f32
    %71 = vector.broadcast %cst_40 : f32 to vector<16x1xf32>
    %72 = arith.mulf %70, %71 : vector<16x1xf32>
    %cst_41 = arith.constant 9.99999974E-6 : f32
    %73 = vector.broadcast %cst_41 : f32 to vector<16x1xf32>
    %74 = arith.addf %72, %73 : vector<16x1xf32>
    %75 = math.rsqrt %74 : vector<16x1xf32>
    %76 = vector.broadcast %75 : vector<16x1xf32> to vector<16x128xf32>
    %77 = arith.mulf %67, %76 : vector<16x128xf32>
    %78 = vector.broadcast %17 : vector<1x128xf32> to vector<16x128xf32>
    %79 = arith.mulf %77, %78 : vector<16x128xf32>
    %80 = vector.broadcast %19 : vector<1x128xf32> to vector<16x128xf32>
    %81 = arith.addf %79, %80 : vector<16x128xf32>
    %c0_42 = arith.constant 0 : index
    %c0_43 = arith.constant 0 : index
    %c0_44 = arith.constant 0 : index
    %82 = vector.load %arg9[%c0_42, %c0_43, %c0_44] : memref<1x128x256xf32, #tpu.memory_space<vmem>>, vector<1x128x256xf32>
    %83 = vector.shape_cast %82 : vector<1x128x256xf32> to vector<128x256xf32>
    %cst_45 = arith.constant dense<0.000000e+00> : vector<16x256xf32>
    %84 = tpu.matmul %81, %83, %cst_45 {dimension_numbers = #tpu.dot_dimension_numbers<[1], [0], [0], [1], [0, 0, 1, 1], [], []>} : vector<16x128xf32>, vector<128x256xf32>, vector<16x256xf32> -> vector<16x256xf32>
    %c0_46 = arith.constant 0 : index
    %c0_47 = arith.constant 0 : index
    %c0_48 = arith.constant 0 : index
    %85 = vector.load %arg6[%c0_46, %c0_47, %c0_48] : memref<1x1x256xf32, #tpu.memory_space<vmem>>, vector<1x1x256xf32>
    %86 = vector.shape_cast %85 : vector<1x1x256xf32> to vector<1x256xf32>
    %87 = vector.broadcast %86 : vector<1x256xf32> to vector<16x256xf32>
    %88 = arith.addf %84, %87 : vector<16x256xf32>
    %cst_49 = arith.constant 5.000000e-01 : f32
    %89 = vector.broadcast %cst_49 : f32 to vector<16x256xf32>
    %90 = arith.mulf %89, %88 : vector<16x256xf32>
    %cst_50 = arith.constant 0.707106769 : f32
    %91 = vector.broadcast %cst_50 : f32 to vector<16x256xf32>
    %92 = arith.mulf %88, %91 : vector<16x256xf32>
    %cst_51 = arith.constant 0.000000e+00 : f32
    %93 = vector.broadcast %cst_51 : f32 to vector<16x256xf32>
    %94 = arith.cmpf oge, %92, %93 : vector<16x256xf32>
    %cst_52 = arith.constant 1.000000e+00 : f32
    %cst_53 = arith.constant -1.000000e+00 : f32
    %95 = vector.broadcast %cst_52 : f32 to vector<16x256xf32>
    %96 = vector.broadcast %cst_53 : f32 to vector<16x256xf32>
    %97 = arith.select %94, %95, %96 : vector<16x256xi1>, vector<16x256xf32>
    %98 = math.absf %92 : vector<16x256xf32>
    %cst_54 = arith.constant 0.327591091 : f32
    %99 = vector.broadcast %cst_54 : f32 to vector<16x256xf32>
    %100 = arith.mulf %99, %98 : vector<16x256xf32>
    %cst_55 = arith.constant 1.000000e+00 : f32
    %101 = vector.broadcast %cst_55 : f32 to vector<16x256xf32>
    %102 = arith.addf %101, %100 : vector<16x256xf32>
    %cst_56 = arith.constant 1.000000e+00 : f32
    %103 = vector.broadcast %cst_56 : f32 to vector<16x256xf32>
    %104 = arith.divf %103, %102 : vector<16x256xf32>
    %cst_57 = arith.constant 1.06140542 : f32
    %105 = vector.broadcast %cst_57 : f32 to vector<16x256xf32>
    %106 = arith.mulf %105, %104 : vector<16x256xf32>
    %cst_58 = arith.constant -1.45315206 : f32
    %107 = vector.broadcast %cst_58 : f32 to vector<16x256xf32>
    %108 = arith.addf %106, %107 : vector<16x256xf32>
    %109 = arith.mulf %108, %104 : vector<16x256xf32>
    %cst_59 = arith.constant 1.42141378 : f32
    %110 = vector.broadcast %cst_59 : f32 to vector<16x256xf32>
    %111 = arith.addf %109, %110 : vector<16x256xf32>
    %112 = arith.mulf %111, %104 : vector<16x256xf32>
    %cst_60 = arith.constant -0.284496725 : f32
    %113 = vector.broadcast %cst_60 : f32 to vector<16x256xf32>
    %114 = arith.addf %112, %113 : vector<16x256xf32>
    %115 = arith.mulf %114, %104 : vector<16x256xf32>
    %cst_61 = arith.constant 0.254829586 : f32
    %116 = vector.broadcast %cst_61 : f32 to vector<16x256xf32>
    %117 = arith.addf %115, %116 : vector<16x256xf32>
    %118 = arith.mulf %117, %104 : vector<16x256xf32>
    %cst_62 = arith.constant 0.000000e+00 : f32
    %119 = vector.broadcast %cst_62 : f32 to vector<16x256xf32>
    %120 = arith.subf %119, %98 : vector<16x256xf32>
    %121 = arith.mulf %120, %98 : vector<16x256xf32>
    %122 = math.exp %121 : vector<16x256xf32>
    %123 = arith.mulf %118, %122 : vector<16x256xf32>
    %cst_63 = arith.constant 1.000000e+00 : f32
    %124 = vector.broadcast %cst_63 : f32 to vector<16x256xf32>
    %125 = arith.subf %124, %123 : vector<16x256xf32>
    %126 = arith.mulf %97, %125 : vector<16x256xf32>
    %cst_64 = arith.constant 1.000000e+00 : f32
    %127 = vector.broadcast %cst_64 : f32 to vector<16x256xf32>
    %128 = arith.addf %127, %126 : vector<16x256xf32>
    %129 = arith.mulf %90, %128 : vector<16x256xf32>
    %c0_65 = arith.constant 0 : index
    %c0_66 = arith.constant 0 : index
    %c0_67 = arith.constant 0 : index
    %130 = vector.load %arg10[%c0_65, %c0_66, %c0_67] : memref<1x256x128xf32, #tpu.memory_space<vmem>>, vector<1x256x128xf32>
    %131 = vector.shape_cast %130 : vector<1x256x128xf32> to vector<256x128xf32>
    %cst_68 = arith.constant dense<0.000000e+00> : vector<16x128xf32>
    %132 = tpu.matmul %129, %131, %cst_68 {dimension_numbers = #tpu.dot_dimension_numbers<[1], [0], [0], [1], [0, 0, 1, 1], [], []>} : vector<16x256xf32>, vector<256x128xf32>, vector<16x128xf32> -> vector<16x128xf32>
    %133 = vector.broadcast %21 : vector<1x128xf32> to vector<16x128xf32>
    %134 = arith.addf %132, %133 : vector<16x128xf32>
    %135 = arith.addf %81, %134 : vector<16x128xf32>
    %136 = vector.shape_cast %135 : vector<16x128xf32> to vector<2x8x128xf32>
    %c0_69 = arith.constant 0 : index
    %c0_70 = arith.constant 0 : index
    %c0_71 = arith.constant 0 : index
    %137 = vector.load %arg11[%c0_69, %c0_70, %c0_71] : memref<2x8x128xf32, #tpu.memory_space<vmem>>, vector<2x8x128xf32>
    tpu.vector_store %arg11[%c0_69, %c0_70, %c0_71], %136 {strides = array<i32>} : memref<2x8x128xf32, #tpu.memory_space<vmem>>, vector<2x8x128xf32>,
    return
  }
  func.func @transform_0(%arg0: i32, %arg1: i32) -> (i32, i32, i32) {
    %c0_i32 = arith.constant 0 : i32
    %c0_i32_0 = arith.constant 0 : i32
    %c0_i32_1 = arith.constant 0 : i32
    return %arg0, %c0_i32, %c0_i32_0 : i32, i32, i32
  }
  func.func @transform_1(%arg0: i32, %arg1: i32) -> (i32, i32) {
    %c0_i32 = arith.constant 0 : i32
    %c0_i32_0 = arith.constant 0 : i32
    %c0_i32_1 = arith.constant 0 : i32
    return %c0_i32, %c0_i32_0 : i32, i32
  }
  func.func @transform_2(%arg0: i32, %arg1: i32) -> (i32, i32, i32) {
    %c0_i32 = arith.constant 0 : i32
    %c0_i32_0 = arith.constant 0 : i32
    %c0_i32_1 = arith.constant 0 : i32
    return %arg1, %c0_i32, %c0_i32_0 : i32, i32, i32
  }
  func.func @transform_3(%arg0: i32, %arg1: i32) -> (i32, i32, i32) {
    %c0_i32 = arith.constant 0 : i32
    %c0_i32_0 = arith.constant 0 : i32
    %c0_i32_1 = arith.constant 0 : i32
    return %arg1, %c0_i32, %c0_i32_0 : i32, i32, i32
  }
  func.func @transform_4(%arg0: i32, %arg1: i32) -> (i32, i32, i32) {
    %c0_i32 = arith.constant 0 : i32
    %c0_i32_0 = arith.constant 0 : i32
    %c0_i32_1 = arith.constant 0 : i32
    return %arg1, %c0_i32, %c0_i32_0 : i32, i32, i32
  }
  func.func @transform_5(%arg0: i32, %arg1: i32) -> (i32, i32, i32) {
    %c0_i32 = arith.constant 0 : i32
    %c0_i32_0 = arith.constant 0 : i32
    %c0_i32_1 = arith.constant 0 : i32
    return %arg1, %c0_i32, %c0_i32_0 : i32, i32, i32
  }
  func.func @transform_6(%arg0: i32, %arg1: i32) -> (i32, i32, i32) {
    %c0_i32 = arith.constant 0 : i32
    %c0_i32_0 = arith.constant 0 : i32
    %c0_i32_1 = arith.constant 0 : i32
    return %arg1, %c0_i32, %c0_i32_0 : i32, i32, i32
  }
  func.func @transform_7(%arg0: i32, %arg1: i32) -> (i32, i32, i32) {
    %c0_i32 = arith.constant 0 : i32
    %c0_i32_0 = arith.constant 0 : i32
    %c0_i32_1 = arith.constant 0 : i32
    return %arg1, %c0_i32, %c0_i32_0 : i32, i32, i32
  }
  func.func @transform_8(%arg0: i32, %arg1: i32) -> (i32, i32, i32) {
    %c0_i32 = arith.constant 0 : i32
    %c0_i32_0 = arith.constant 0 : i32
    %c0_i32_1 = arith.constant 0 : i32
    return %arg1, %c0_i32, %c0_i32_0 : i32, i32, i32
  }
  func.func @transform_9(%arg0: i32, %arg1: i32) -> (i32, i32, i32) {
    %c0_i32 = arith.constant 0 : i32
    %c0_i32_0 = arith.constant 0 : i32
    %c0_i32_1 = arith.constant 0 : i32
    return %arg0, %c0_i32, %c0_i32_0 : i32, i32, i32
  }
}

</mosaic_0001>

<bundles_post_ra>
// kernel: tpu_custom_call.1
= control target key start
LH: loop header
LB: loop body
LE: loop exit
PB: predicated region body
PF: predicated region fallthrough
CT: control target
= control target key end

     0   :  { %s3534_s0 = inlined_call_operand.vmem [shape: f32[2,8,128], index: 0, kind: input, shape index: {}]   ;;  %s3535_s1 = inlined_call_operand.hbm [shape: f32[128,128], index: 1, kind: input, shape index: {}]   ;;  %s3536_s2 = inlined_call_operand.vmem [shape: f32[2,6,128], index: 2, kind: input, shape index: {}]   ;;  %s3537_s3 = inlined_call_operand.vmem [shape: f32[2,1,384], index: 3, kind: input, shape index: {}]   ;;  %s3538_s4 = inlined_call_operand.vmem [shape: f32[2,1,256], index: 4, kind: input, shape index: {}]   ;;  %s3539_s5 = inlined_call_operand.hbm [shape: f32[2,128,384], index: 5, kind: input, shape index: {}]   ;;  %s3540_s6 = inlined_call_operand.hbm [shape: f32[2,128,128], index: 6, kind: input, shape index: {}]   ;;  %s3541_s7 = inlined_call_operand.hbm [shape: f32[2,128,256], index: 7, kind: input, shape index: {}]   ;;  %s3542_s8 = inlined_call_operand.hbm [shape: f32[2,256,128], index: 8, kind: input, shape index: {}]   ;;  %s3543_s9 = inlined_call_operand.hbm [shape: f32[2,8,128], index: 9, kind: output, shape index: {}]  }
   0x1   :  { %3547 = sst [smem:[#allocation21_spill]] %s3539_s5 }
   0x2   :  { %3548 = sst [smem:[#allocation22_spill]] %s3540_s6 }
   0x3   :  { %3549 = sst [smem:[#allocation23_spill]] %s3543_s9 }
   0x4   :  { %14 = vsyncpa [#allocation5], 0 }
   0x5   :  { %15 = vsyncpa [#allocation8], 0 }
   0x6   :  { %17 = vsyncpa [#allocation8 + $0x1], 0 }
   0x7   :  { %18 = vsyncpa [#allocation11], 0 }
   0x8   :  { %20 = vsyncpa [#allocation11 + $0x1], 0 }
   0x9   :  { %21 = vsyncpa [#allocation6], 0  ;;  %s2860_s30 = smov 0   ;;  %s2862_s10 = smov 0  }
   0xa   :  { %s2864_s11 = smov 0   ;;  %s2866_s12 = smov 0  }
   0xb   :  { %s2868_s13 = smov 0   ;;  %s2870_s14 = smov 0  }
   0xc LB: > { %3550 = sst [smem:[#allocation18_spill]] %s2774_s11  ;;  %s36_s15 = sadd.s32 1, %s2782_s13  ;;  %s2786_s14 = sphi %s2870_s14, %s27_s14   ;;  %s2782_s13 = sphi %s2868_s13, %s3568_s13   ;;  %s2778_s12 = sphi %s2866_s12, %s3567_s12   ;;  %s2774_s11 = sphi %s2864_s11, %s3566_s11   ;;  %s2770_s10 = sphi %s2862_s10, %s3565_s10   ;;  %s2766_s30 = sphi %s2860_s30, %s3564_s30  }
   0xd   : > { %s171_s16 = sadd.s32 1, %s2774_s11  ;;  %p37_p0 = scmp.ge.s32.totalorder %s36_s15, 2 }
   0xe   : > { %p178_p1 = scmp.ne.s32.totalorder %s2774_s11, %s2770_s10  ;;  %p179_p2 = scmp.eq.s32.totalorder %s2786_s14, 0 }
   0xf   : > { %s3570_s15 = smov (%p37_p0, %s36_s15), 0  ;;  %p2396_p4 = scmp.lt.s32.totalorder %s2786_s14, 2 }
  0x10   : > { %3551 = sst [smem:[#allocation19_spill]] %s3570_s15  ;;  %p180_p3 = por %p179_p2, %p178_p1 }
  0x11   : > { %s168_s17 = ssub.s32 %s2782_s13, %s3570_s15  ;;  %s3544_s18 = sand.u32 1, %s2786_s14  }
  0x12   : > { %p169_p5 = scmp.eq.s32.totalorder %s168_s17, 0  ;;  %s2902_s19 = sand.u32 1, %s2774_s11  }
  0x13   : > { %s2359_s20 = smul.u32 6144, %s2782_s13  ;;  %s3553_s5 = sld [smem:[#allocation21_spill]] }
  0x14   : > { %s2906_s21 = scalar_select %p169_p5, %s2774_s11, %s171_s16  }
  0x15   : > { %s2358_s22 = smul.u32 384, %s2902_s19  ;;  %p2912_p6 = pnand %p2396_p4, %p180_p3 }
  0x16   : > { %3552 = sst [smem:[#allocation20_spill]] %s2906_s21  ;;  %s2918_s29 = scalar_lea.sflag [#allocation8], %s3544_s18 }
  0x17   : > { %s359_s27 = scalar_lea.vmem [#allocation7], %s2358_s22  ;;  %p2560_p7 = pneg %p2912_p6 }
  0x18   : > { %s366_s28 = sshll.u32 %s359_s27, 4  ;;  %s2792_s17 = smov [#allocation7]   ;;  %s367_s28 = int_to_ptr.vmem [resolvable:$true] %s366_s28 }
  0x19   : > { %s365_s25 = scalar_lea.hbm %s3553_s5, %s2359_s20  ;;  %s2571_s16 = scalar_lea.vmem %s367_s28, 6144 }
  0x1a   : > { %p2572_p8 = scmp.ne.s32.totalorder %s367_s28, %s2571_s16  ;;  %s2576_s20 = sshll.u32 %s2792_s17, 4  ;;  %s2577_s20 = int_to_ptr.vmem [resolvable:$false] %s2576_s20 }
  0x1b   : > { %s2578_s23 = scalar_lea.vmem %s2577_s20, 12288  ;;  %p2579_p11 = scmp.lt.s32.totalorder %s367_s28, %s2577_s20 }
  0x1c   : > { %p2574_p9 = pnand %p2572_p8, %p2560_p7  ;;  %p2580_p12 = scmp.lt.s32.totalorder %s2578_s23, %s2571_s16 }
  0x1e   : > { %p2575_p10 = pneg %p2574_p9  ;;  %p2581_p13 = por %p2580_p12, %p2579_p11 }
  0x20   : > { %p2582_p0 = pnand %p2581_p13, %p2575_p10 }
  0x22   : > { %2585 = shalt.err (!%p2582_p0)
}
  0x23   : > { %s2793_s22 = smov 384   ;;  %s2794_s24 = smov 24  }
  0x24   : > { %2385 = dma.hbm_to_vmem [thread:$0]  (!%p2912_p6), %s365_s25, 6144, %s367_s28, %s2918_s29, %s2793_s22, %s2793_s22, %s2794_s24  }
  0x25   : > { %s2040_s27 = sshll.u32 %s2902_s19, 8  ;;  %s2084_s18 = sshll.u32 %s2782_s13, 12 }
  0x26   : > { %s407_s20 = scalar_lea.hbm %s3541_s7, %s2084_s18  ;;  %s401_s16 = scalar_lea.vmem [#allocation10], %s2040_s27 }
  0x27   : > { %s408_s23 = sshll.u32 %s401_s16, 4  ;;  %s3555_s15 = sand.u32 1, %s2786_s14   ;;  %s409_s23 = int_to_ptr.vmem [resolvable:$true] %s408_s23 }
  0x28   : > { %s2935_s21 = scalar_lea.sflag [#allocation11], %s3555_s15  ;;  %s2599_s11 = scalar_lea.vmem %s409_s23, 4096 }
  0x29   : > { %p2600_p1 = scmp.ne.s32.totalorder %s409_s23, %s2599_s11  ;;  %s2795_s9 = smov [#allocation10]  }
  0x2a   : > { %s2604_s25 = sshll.u32 %s2795_s9, 4  ;;  %s2605_s25 = int_to_ptr.vmem [resolvable:$false] %s2604_s25 }
  0x2b   : > { %p2602_p2 = pnand %p2600_p1, %p2560_p7  ;;  %s2606_s28 = scalar_lea.vmem %s2605_s25, 8192 }
  0x2c   : > { %p2607_p4 = scmp.lt.s32.totalorder %s409_s23, %s2605_s25  ;;  %p2608_p5 = scmp.lt.s32.totalorder %s2606_s28, %s2599_s11 }
  0x2d   : > { %p2603_p3 = pneg %p2602_p2 }
  0x2e   : > { %p2609_p8 = por %p2608_p5, %p2607_p4 }
  0x30   : > { %p2610_p9 = pnand %p2609_p8, %p2603_p3 }
  0x32   : > { %2613 = shalt.err (!%p2610_p9)
}
  0x33   : > { %s2796_s5 = smov 256   ;;  %s2797_s15 = smov 16  }
  0x34   : > { %2391 = dma.hbm_to_vmem [thread:$0]  (!%p2912_p6), %s407_s20, 4096, %s409_s23, %s2935_s21, %s2796_s5, %s2796_s5, %s2797_s15  }
  0x35   : > { %s2946_s24 = scalar_lea.hbm %s3542_s8, %s2084_s18  ;;  %s422_s11 = scalar_lea.vmem [#allocation12], %s2040_s27 }
  0x36   : > { %s429_s17 = sshll.u32 %s422_s11, 4  ;;  %s2951_s16 = sadd.s32 4294967295, %s2786_s14   ;;  %s2948_s17 = int_to_ptr.vmem [resolvable:$true] %s429_s17 }
  0x37   : > { %p184_p10 = scmp.ne.s32.totalorder %s2770_s10, %s2766_s30  ;;  %p185_p11 = scmp.eq.s32.totalorder %s2951_s16, 0 }
  0x38   : > { %p2032_p12 = scmp.ge.s32.totalorder %s2786_s14, 1  ;;  %p299_p13 = scmp.lt.s32.totalorder %s2786_s14, 3 }
  0x39   : > { %p2960_p0 = por %p185_p11, %p184_p10  ;;  %s2798_s27 = smov [#allocation4]  }
  0x3a   : > { %p2964_p1 = pnand %p2032_p12, %p299_p13  ;;  %s320_s23 = sshll.u32 %s2798_s27, 4  ;;  %s321_s23 = int_to_ptr.vmem [resolvable:$true] %s320_s23 }
  0x3b   : > { %s2037_s25 = sshll.u32 %s2902_s19, 7  ;;  %s2083_s30 = sshll.u32 %s2782_s13, 11 }
  0x3c   : > { %p2378_p2 = pneg %p2964_p1  ;;  %s3559_s6 = sld [smem:[#allocation22_spill]] }
  0x3d   : > { %s380_s9 = scalar_lea.vmem [#allocation9], %s2037_s25  ;;  %s2625_s27 = scalar_lea.vmem %s321_s23, 2048 }
  0x3e   : > { %p2974_p3 = pnand %p2378_p2, %p185_p11  ;;  %s387_s11 = sshll.u32 %s380_s9, 4  ;;  %s2983_s11 = int_to_ptr.vmem [resolvable:$true] %s387_s11 }
  0x3f   : > { %p2626_p5 = scmp.ne.s32.totalorder %s321_s23, %s2625_s27  ;;  %p2633_p10 = scmp.lt.s32.totalorder %s321_s23, %s321_s23 }
  0x40   : > { %p2616_p4 = pneg %p2974_p3  ;;  %p2634_p12 = scmp.lt.s32.totalorder %s2625_s27, %s2625_s27 }
  0x42   : > { %s2981_s22 = scalar_lea.hbm %s3559_s6, %s2083_s30  ;;  %p2628_p8 = pnand %p2626_p5, %p2616_p4 }
  0x43   : > { %p2635_p13 = por %p2634_p12, %p2633_p10 }
  0x44   : > { %p2629_p9 = pneg %p2628_p8 }
  0x46   : > { %p2636_p2 = pnand %p2635_p13, %p2629_p9 }
  0x48   : > { %2639 = shalt.err (!%p2636_p2)
}
  0x49   : > { %s2799_s19 = smov 128   ;;  %s2800_s25 = smov 8  }
  0x4a   : > { %2381 = dma.hbm_to_vmem [thread:$0]  (!%p2974_p3), %s3535_s1, 2048, %s321_s23, [#allocation5], %s2799_s19, %s2799_s19, %s2800_s25  }
  0x4b   : > { %s2653_s15 = scalar_lea.vmem %s2983_s11, 2048  ;;  %s2801_s9 = smov [#allocation9]  }
  0x4c   : > { %p2654_p4 = scmp.ne.s32.totalorder %s2983_s11, %s2653_s15  ;;  %s2658_s27 = sshll.u32 %s2801_s9, 4  ;;  %s2659_s27 = int_to_ptr.vmem [resolvable:$false] %s2658_s27 }
  0x4d   : > { %s2660_s6 = scalar_lea.vmem %s2659_s27, 4096  ;;  %p2661_p9 = scmp.lt.s32.totalorder %s2983_s11, %s2659_s27 }
  0x4e   : > { %p2656_p5 = pnand %p2654_p4, %p2560_p7  ;;  %p2662_p10 = scmp.lt.s32.totalorder %s2660_s6, %s2653_s15 }
  0x50   : > { %p2657_p8 = pneg %p2656_p5  ;;  %p2663_p12 = por %p2662_p10, %p2661_p9 }
  0x52   : > { %p2664_p13 = pnand %p2663_p12, %p2657_p8 }
  0x54   : > { %2667 = shalt.err (!%p2664_p13)
}
  0x55   : > { %2388 = dma.hbm_to_vmem [thread:$0]  (!%p2912_p6), %s2981_s22, 2048, %s2983_s11, %s2918_s29, %s2799_s19, %s2799_s19, %s2800_s25  }
  0x56   : > { %s2681_s23 = scalar_lea.vmem %s2948_s17, 4096  ;;  %s2802_s6 = smov [#allocation12]  }
  0x57   : > { %p2682_p3 = scmp.ne.s32.totalorder %s2948_s17, %s2681_s23  ;;  %s2686_s28 = sshll.u32 %s2802_s6, 4  ;;  %s2687_s28 = int_to_ptr.vmem [resolvable:$false] %s2686_s28 }
  0x58   : > { %s2688_s30 = scalar_lea.vmem %s2687_s28, 8192  ;;  %p2689_p5 = scmp.lt.s32.totalorder %s2948_s17, %s2687_s28 }
  0x59   : > { %p2684_p2 = pnand %p2682_p3, %p2560_p7  ;;  %p2690_p8 = scmp.lt.s32.totalorder %s2688_s30, %s2681_s23 }
  0x5b   : > { %p2685_p4 = pneg %p2684_p2  ;;  %p2691_p9 = por %p2690_p8, %p2689_p5 }
  0x5d   : > { %p2692_p10 = pnand %p2691_p9, %p2685_p4 }
  0x5f   : > { %2695 = shalt.err (!%p2692_p10)
}
  0x60   : > { %2394 = dma.hbm_to_vmem [thread:$0]  (!%p2912_p6), %s2946_s24, 4096, %s2948_s17, %s2935_s21, %s2799_s19, %s2799_s19, %s2800_s25  }
  0x61   : > { %441 = sbr.rel (%p2964_p1) target bundleno = 2576 (0xa10), region = 56 }
  0x66   : > { %2749 = dma.done.wait (%p185_p11), [#allocation5], 2048  }
  0x67   : > { %2751 = vsyncadd (%p185_p11), [#allocation5], 4294965248  ;;  %s447_s26 = sand.u32 1, %s2951_s16   ;;  %s449_s29 = sand.u32 1, %s2770_s10  }
  0x68   : > { %s2360_s22 = smul.u32 384, %s449_s29  ;;  %s448_s11 = scalar_lea.sflag [#allocation8], %s447_s26 }
  0x6a   : > { %s3031_s5 = scalar_lea.vmem [#allocation7], %s2360_s22 }
  0x6b   : > { %2753 = dma.done.wait (%p2960_p0), %s448_s11, 8192  }
  0x6c   : > { %2755 = vsyncadd (%p2960_p0), %s448_s11, 4294959104  ;;  %s2048_s21 = sshll.u32 %s449_s29, 7  ;;  %s2049_s24 = sshll.u32 %s449_s29, 8 }
  0x6d   : > { %s3037_s17 = scalar_lea.vmem [#allocation9], %s2048_s21  ;;  %s466_s18 = scalar_lea.sflag [#allocation11], %s447_s26 }
  0x6e   : > { %s3039_s19 = scalar_lea.vmem [#allocation10], %s2049_s24 }
  0x6f   : > { %2757 = dma.done.wait (%p2960_p0), %s466_s18, 8192  }
  0x70   : > { %2759 = vsyncadd (%p2960_p0), %s466_s18, 4294959104  ;;  %p546_p6 = scmp.lt.s32.totalorder %s2778_s12, 1  ;;  %s3062_s21 = scalar_lea.vmem [#allocation12], %s2049_s24 }
  0x71   : > { %p2053_p7 = scmp.ne.s32.totalorder %s2778_s12, 0 }
  0x72   : > { %s547_s25 = scalar_select %p546_p6, %s2778_s12, 1 }
  0x73   : > { %562 = sbr.rel (%p2053_p7) target bundleno = 122 (0x7a), region = 80 }
  0x74   : > { %s2051_s15 = sshll.u32 %s547_s25, 3  ;;  %s2361_s9 = smul.u32 3, %s547_s25 }
  0x75   : > { %s3050_s6 = scalar_lea.vmem %s3536_s2, %s2051_s15  ;;  %s2052_s28 = sshll.u32 %s547_s25, 1 }
  0x76   : > { %s3055_s29 = scalar_lea.vmem %s3537_s3, %s2361_s9  ;;  %s3060_s11 = scalar_lea.vmem %s3538_s4, %s2052_s28 }
  0x78   : > { %v563_v0 = vld [vmem:[%s3534_s0] sm:$0xff]  ;;  %v564_v1 = vld [vmem:[%s3534_s0 + $0x8] sm:$0xff] }
  0x79   : > { %565 = vst [vmem:[#allocation13] sm:$0xff] %v563_v0  ;;  %566 = vst [vmem:[#allocation13 + $0x8] sm:$0xff] %v564_v1 }
  0x7a PF: > { %v2803_v4 = vmov 0.0   ;;  %v3073_v5 = vld [vmem:[%s3050_s6 + $0x2] ss:$0 sm:$0xff]  ;;  %v3076_v6 = vld [vmem:[%s3050_s6 + $0x3] ss:$0 sm:$0xff]  ;;  %v662_v9 = vld [vmem:[%s3031_s5 + $0x170] sm:$0xff]  ;;  %v569_v19 = vlaneseq }
  0x7b   : > { %745 = vmatprep.mubr.f32.mxu0 %v2803_v4  ;;  %v3079_v7 = vld [vmem:[%s3050_s6 + $0x4] ss:$0 sm:$0xff]  ;;  %v3082_v8 = vld [vmem:[%s3050_s6 + $0x5] ss:$0 sm:$0xff]  ;;  %v661_v10 = vld [vmem:[%s3031_s5 + $0x168] sm:$0xff]  ;;  %681 = vmatprep.subr.mxu0 %v662_v9  ;;  %s3170_s12 = smov 0  }
  0x7c   : > { %v659_v11 = vld [vmem:[%s3031_s5 + $0x158] sm:$0xff]  ;;  %v658_v12 = vld [vmem:[%s3031_s5 + $0x150] sm:$0xff]  ;;  %682 = vmatpush1.msra.mxu0 %v661_v10  ;;  %v656_v13 = vld [vmem:[%s3031_s5 + $0x140] sm:$0xff]  ;;  %v570_v20 = vand.u32 127, %v569_v19 }
  0x7d   : > { %v663_v14 = vld [vmem:[%s3031_s5 + $0x178] sm:$0xff]  ;;  %683 = vmatprep.subr.mxu0 %v659_v11  ;;  %v660_v16 = vld [vmem:[%s3031_s5 + $0x160] sm:$0xff]  ;;  %v653_v17 = vld [vmem:[%s3031_s5 + $0x128] sm:$0xff] }
  0x7e   : > { %2195 = vmatprep.subr.mxu1 %v663_v14  ;;  %v655_v15 = vld [vmem:[%s3031_s5 + $0x138] sm:$0xff]  ;;  %684 = vmatpush1.msra.mxu0 %v658_v12  ;;  %v652_v18 = vld [vmem:[%s3031_s5 + $0x120] sm:$0xff]  ;;  %vm571_vm0 = vcmp.lt.s32.totalorder %v570_v20, 40  ;;  %v650_v32 = vld [vmem:[%s3031_s5 + $0x110] sm:$0xff] }
  0x7f   : > { %2196 = vmatpush3.msra.mxu1 %v663_v14  ;;  %685 = vmatprep.subr.mxu0 %v656_v13  ;;  %v3096_v23 = vsel %vm571_vm0, 1.0, %v2803_v4  ;;  %v657_v33 = vld [vmem:[%s3031_s5 + $0x148] sm:$0xff]  ;;  %v647_v35 = vld [vmem:[%s3031_s5 + $0xf8] sm:$0xff]  ;;  %v654_v36 = vld [vmem:[%s3031_s5 + $0x130] sm:$0xff] }
  0x80   : > { %v567_v2 = vld [vmem:[#allocation13] sm:$0xff]  ;;  %v568_v3 = vld [vmem:[#allocation13 + $0x8] sm:$0xff]  ;;  %2197 = vmatprep.subr.mxu1 %v660_v16  ;;  %686 = vmatpush1.msra.mxu0 %v655_v15  ;;  %v646_v37 = vld [vmem:[%s3031_s5 + $0xf0] sm:$0xff] }
  0x81   : > { %580 = vadd.xlane.f32.xlu0 %v567_v2  ;;  %2198 = vmatpush3.msra.mxu1 %v660_v16  ;;  %v649_v34 = vld [vmem:[%s3031_s5 + $0x108] sm:$0xff]  ;;  %v644_v38 = vld [vmem:[%s3031_s5 + $0xe0] sm:$0xff]  ;;  %v651_v39 = vld [vmem:[%s3031_s5 + $0x118] sm:$0xff] }
  0x82   : > { %687 = vmatprep.subr.mxu0 %v653_v17  ;;  %2199 = vmatprep.subr.mxu1 %v657_v33  ;;  %v643_v40 = vld [vmem:[%s3031_s5 + $0xd8] sm:$0xff]  ;;  %v641_v41 = vld [vmem:[%s3031_s5 + $0xc8] sm:$0xff]  ;;  %v648_v42 = vld [vmem:[%s3031_s5 + $0x100] sm:$0xff] }
  0x83   : > { %688 = vmatpush1.msra.mxu0 %v652_v18  ;;  %2200 = vmatpush3.msra.mxu1 %v657_v33  ;;  %v640_v43 = vld [vmem:[%s3031_s5 + $0xc0] sm:$0xff]  ;;  %v638_v44 = vld [vmem:[%s3031_s5 + $0xb0] sm:$0xff]  ;;  %v645_v45 = vld [vmem:[%s3031_s5 + $0xe8] sm:$0xff] }
  0x84   : > { %689 = vmatprep.subr.mxu0 %v650_v32  ;;  %2201 = vmatprep.subr.mxu1 %v654_v36  ;;  %v637_v46 = vld [vmem:[%s3031_s5 + $0xa8] sm:$0xff]  ;;  %v635_v47 = vld [vmem:[%s3031_s5 + $0x98] sm:$0xff]  ;;  %v642_v48 = vld [vmem:[%s3031_s5 + $0xd0] sm:$0xff] }
  0x85   : > { %582 = vadd.xlane.f32.xlu0 %v568_v3  ;;  %690 = vmatpush1.msra.mxu0 %v649_v34  ;;  %v634_v49 = vld [vmem:[%s3031_s5 + $0x90] sm:$0xff]  ;;  %v632_v50 = vld [vmem:[%s3031_s5 + $0x80] sm:$0xff]  ;;  %v639_v51 = vld [vmem:[%s3031_s5 + $0xb8] sm:$0xff] }
  0x86   : > { %691 = vmatprep.subr.mxu0 %v647_v35  ;;  %2202 = vmatpush3.msra.mxu1 %v654_v36  ;;  %v631_v52 = vld [vmem:[%s3031_s5 + $0x78] sm:$0xff]  ;;  %v629_v53 = vld [vmem:[%s3031_s5 + $0x68] sm:$0xff]  ;;  %v636_v54 = vld [vmem:[%s3031_s5 + $0xa0] sm:$0xff] }
  0x87   : > { %692 = vmatpush1.msra.mxu0 %v646_v37  ;;  %2203 = vmatprep.subr.mxu1 %v651_v39  ;;  %v628_v55 = vld [vmem:[%s3031_s5 + $0x60] sm:$0xff]  ;;  %v626_v56 = vld [vmem:[%s3031_s5 + $0x50] sm:$0xff]  ;;  %v633_v57 = vld [vmem:[%s3031_s5 + $0x88] sm:$0xff] }
  0x88   : > { %693 = vmatprep.subr.mxu0 %v644_v38  ;;  %2204 = vmatpush3.msra.mxu1 %v651_v39  ;;  %v625_v58 = vld [vmem:[%s3031_s5 + $0x48] sm:$0xff]  ;;  %v623_v59 = vld [vmem:[%s3031_s5 + $0x38] sm:$0xff]  ;;  %v630_v60 = vld [vmem:[%s3031_s5 + $0x70] sm:$0xff] }
  0x89   : > { %694 = vmatpush1.msra.mxu0 %v643_v40  ;;  %2205 = vmatprep.subr.mxu1 %v648_v42  ;;  %v622_v61 = vld [vmem:[%s3031_s5 + $0x30] sm:$0xff]  ;;  %v620_v62 = vld [vmem:[%s3031_s5 + $0x20] sm:$0xff]  ;;  %v627_v63 = vld [vmem:[%s3031_s5 + $0x58] sm:$0xff] }
  0x8a   : > { %695 = vmatprep.subr.mxu0 %v641_v41  ;;  %2206 = vmatpush3.msra.mxu1 %v648_v42  ;;  %v619_v0 = vld [vmem:[%s3031_s5 + $0x18] sm:$0xff]  ;;  %v617_v1 = vld [vmem:[%s3031_s5 + $0x8] sm:$0xff]  ;;  %v618_v10 = vld [vmem:[%s3031_s5 + $0x10] sm:$0xff] }
  0x8b   : > { %696 = vmatpush1.msra.mxu0 %v640_v43  ;;  %2207 = vmatprep.subr.mxu1 %v645_v45  ;;  %v621_v9 = vld [vmem:[%s3031_s5 + $0x28] sm:$0xff]  ;;  %v2055_v18 = vld [vmem:[%s3050_s6] ss:$0 sm:$0xff] }
  0x8c   : > { %697 = vmatprep.subr.mxu0 %v638_v44  ;;  %2208 = vmatpush3.msra.mxu1 %v645_v45  ;;  %v664_v32 = vld [vmem:[%s3055_s29] sm:$0x7] }
  0x8d   : > { %698 = vmatpush1.msra.mxu0 %v637_v46  ;;  %2209 = vmatprep.subr.mxu1 %v642_v48 }
  0x8e   : > { %699 = vmatprep.subr.mxu0 %v635_v47  ;;  %2210 = vmatpush3.msra.mxu1 %v642_v48 }
  0x8f   : > { %700 = vmatpush1.msra.mxu0 %v634_v49  ;;  %2211 = vmatprep.subr.mxu1 %v639_v51 }
  0x90   : > { %701 = vmatprep.subr.mxu0 %v632_v50  ;;  %2212 = vmatpush3.msra.mxu1 %v639_v51 }
  0x91   : > { %702 = vmatpush1.msra.mxu0 %v631_v52  ;;  %2213 = vmatprep.subr.mxu1 %v636_v54 }
  0x92   : > { %703 = vmatprep.subr.mxu0 %v629_v53  ;;  %2214 = vmatpush3.msra.mxu1 %v636_v54 }
  0x93   : > { %704 = vmatpush1.msra.mxu0 %v628_v55  ;;  %2215 = vmatprep.subr.mxu1 %v633_v57 }
  0x94   : > { %705 = vmatprep.subr.mxu0 %v626_v56  ;;  %2216 = vmatpush3.msra.mxu1 %v633_v57 }
  0x95   : > { %706 = vmatpush1.msra.mxu0 %v625_v58  ;;  %2217 = vmatprep.subr.mxu1 %v630_v60 }
  0x96   : > { %707 = vmatprep.subr.mxu0 %v623_v59  ;;  %2218 = vmatpush3.msra.mxu1 %v630_v60 }
  0x97   : > { %708 = vmatpush1.msra.mxu0 %v622_v61  ;;  %2219 = vmatprep.subr.mxu1 %v627_v63 }
  0x98   : > { %709 = vmatprep.subr.mxu0 %v620_v62  ;;  %2220 = vmatpush3.msra.mxu1 %v627_v63 }
  0x99   : > { %710 = vmatpush1.msra.mxu0 %v619_v0 }
  0x9a   : > { %711 = vmatprep.subr.mxu0 %v617_v1 }
 0x10a   : > { %v581_v21 = vpop.xlane.xlu0 %580 }
 0x10b   : > { %v584_v22 = vmul.f32 0.025, %v581_v21  ;;  %v2056_v21 = vld [vmem:[%s3050_s6 + $0x1] ss:$0 sm:$0xff] }
 0x10d   : > { %v586_v24 = vsub.f32 %v567_v2, %v584_v22  ;;  %v624_v2 = vld [vmem:[%s3031_s5 + $0x40] sm:$0xff] }
 0x10e   : > { %v583_v25 = vpop.xlane.xlu0 %582  ;;  %2221 = vmatprep.subr.mxu1 %v624_v2 }
 0x10f   : > { %v585_v26 = vmul.f32 0.025, %v583_v25  ;;  %v3099_v27 = vmul.f32 %v3096_v23, %v586_v24  ;;  %2222 = vmatpush3.msra.mxu1 %v624_v2 }
 0x110   : > { %2223 = vmatprep.subr.mxu1 %v621_v9 }
 0x111   : > { %v587_v28 = vsub.f32 %v568_v3, %v585_v26  ;;  %v590_v29 = vmul.f32 %v3099_v27, %v3099_v27  ;;  %v616_v3 = vld [vmem:[%s3031_s5] sm:$0xff]  ;;  %2224 = vmatpush3.msra.mxu1 %v621_v9 }
 0x112   : > { %712 = vmatpush1.msra.mxu0 %v616_v3  ;;  %2225 = vmatprep.subr.mxu1 %v618_v10 }
 0x113   : > { %592 = vadd.xlane.f32.xlu1 %v590_v29  ;;  %v3104_v30 = vmul.f32 %v3096_v23, %v587_v28  ;;  %2226 = vmatpush3.msra.mxu1 %v618_v10 }
 0x115   : > { %v591_v31 = vmul.f32 %v3104_v30, %v3104_v30 }
 0x117   : > { %594 = vadd.xlane.f32.xlu1 %v591_v31 }
 0x19c   : > { %v593_v11 = vpop.xlane.xlu1 %592 }
 0x19d   : > { %v596_v12 = vmul.f32 0.025, %v593_v11 }
 0x19f   : > { %v598_v13 = vadd.f32 1e-05, %v596_v12 }
 0x1a0   : > { %v595_v14 = vpop.xlane.xlu1 %594 }
 0x1a1   : > { %2470 = vrsqrt.f32 %v598_v13  ;;  %v597_v15 = vmul.f32 0.025, %v595_v14 }
 0x1a3   : > { %v599_v16 = vadd.f32 1e-05, %v597_v15 }
 0x1a5   : > { %2472 = vrsqrt.f32 %v599_v16 }
 0x1ae   : > { %v2471_v17 = vpop.eup %2470 }
 0x1af   : > { %v602_v20 = vmul.f32 %v2471_v17, %v3099_v27  ;;  %v3160_v27 = vshrl.u32 %v569_v19, 7 }
 0x1b1   : > { %v608_v22 = vmul.f32 %v2055_v18, %v602_v20  ;;  %v668_v31 = vsub.s32 0, %v3160_v27  ;;  %v676_v34 = vsub.s32 2, %v3160_v27 }
 0x1b2   : > { %v2473_v24 = vpop.eup %2472 }
 0x1b3   : > { %v3149_v25 = vadd.f32 %v2056_v21, %v608_v22  ;;  %v603_v26 = vmul.f32 %v2473_v24, %v3104_v30  ;;  %v672_v30 = vsub.s32 1, %v3160_v27  ;;  %v669_v33 = vrot.slane %v664_v32, %v668_v31 }
 0x1b4   : > { %v677_v38 = vrot.slane %v664_v32, %v676_v34 }
 0x1b5   : > { %746 = vmatmul.mubr.f32.vlgmr.msra.gmra.mxu0 %v3149_v25  ;;  %2227 = vmatprep.mubr.f32.mxu1 %v3149_v25  ;;  %v609_v28 = vmul.f32 %v2055_v18, %v603_v26  ;;  %v673_v35 = vrot.slane %v664_v32, %v672_v30 }
 0x1b6   : > { %751 = vmatprep.mubr.f32.mxu0 %v2803_v4 }
 0x1b7   : > { %v3155_v29 = vadd.f32 %v2056_v21, %v609_v28 }
 0x1b9   : > { %752 = vmatmul.mubr.f32.gmra.mxu0 %v3155_v29  ;;  %2228 = vmatmul.mubr.f32.vlgmr.msra.gmra.mxu1 %v3155_v29 }
 0x275   : > { %v747_v36 = vpop.f32.mrf.mxu0 }
 0x276   : > { %v748_v37 = vadd.f32 %v747_v36, %v669_v33 }
 0x277   : > { %v749_v39 = vpop.f32.mrf.mxu0 }
 0x278   : > { %833 = vst [vmem:[#allocation2] sm:$0xff] %v748_v37  ;;  %v750_v19 = vadd.f32 %v749_v39, %v673_v35 }
 0x279   : > { %v753_v40 = vpop.f32.mrf.mxu0  ;;  %v2229_v41 = vpop.f32.mrf.mxu1 }
 0x27a   : > { %834 = vst [vmem:[#allocation2 + $0x8] sm:$0xff] %v750_v19  ;;  %v754_v42 = vadd.f32 %v753_v40, %v669_v33  ;;  %v830_v43 = vadd.f32 %v2229_v41, %v677_v38 }
 0x27b   : > { %v755_v44 = vpop.f32.mrf.mxu0  ;;  %v824_v45 = vpop.f32.mrf.mxu1 }
 0x27c   : > { %836 = vst [vmem:[#allocation2 + $0x18] sm:$0xff] %v754_v42  ;;  %838 = vst [vmem:[#allocation2 + $0x28] sm:$0xff] %v830_v43  ;;  %v756_v46 = vadd.f32 %v755_v44, %v673_v35  ;;  %v825_v47 = vadd.f32 %v824_v45, %v677_v38 }
 0x27e   : > { %837 = vst [vmem:[#allocation2 + $0x20] sm:$0xff] %v756_v46  ;;  %835 = vst [vmem:[#allocation2 + $0x10] sm:$0xff] %v825_v47 }
 0x27f LB: >> { %s2057_s5 = sshll.u32 %s2790_s12, 3  ;;  %vm886_vm1 = vcmask 64512   ;;  %v1111_v24 = vld [vmem:[#allocation4 + $0x78] sm:$0xff]  ;;  %v1110_v32 = vld [vmem:[#allocation4 + $0x70] sm:$0xff]  ;;  %v1109_v37 = vld [vmem:[#allocation4 + $0x68] sm:$0xff]  ;;  %vm2805_vm2 = vmmov 0   ;;  %s2790_s12 = sphi %s3170_s12, %s844_s12  }
 0x280   : >> { %s846_s24 = sshra.s32 %s2057_s5, 3  ;;  %v1108_v19 = vld [vmem:[#allocation4 + $0x60] sm:$0xff]  ;;  %v1107_v42 = vld [vmem:[#allocation4 + $0x58] sm:$0xff]  ;;  %v1106_v45 = vld [vmem:[#allocation4 + $0x50] sm:$0xff]  ;;  %s1342_s6 = scalar_lea.vmem [#allocation3], %s2057_s5 }
 0x281   : >> { %s2086_s9 = smul.u32 24, %s846_s24  ;;  %s844_s12 = sadd.s32 1, %s2790_s12  }
 0x282   : >> { %p841_p11 = scmp.ge.s32.totalorder %s844_s12, 2  }
 0x283   : >> { %s3178_s23 = scalar_lea.vmem [#allocation2], %s2086_s9  ;;  %p2398_p0 = scmp.eq.s32.totalorder (%p841_p11), %s2951_s16, 1 }
 0x285   : >> { %v851_v48 = vld [vmem:[%s3178_s23] sm:$0xff]  ;;  %v852_v49 = vld [vmem:[%s3178_s23 + $0x8] sm:$0xff] }
 0x286   : >> { %854 = vxpose.xlu0.b32.start.end [1/1] (short) %v851_v48, 128  ;;  %2230 = vmatprep.subr.mxu0 %v852_v49  ;;  %v1105_v48 = vld [vmem:[#allocation4 + $0x48] sm:$0xff] }
 0x287   : >> { %2231 = vmatpush3.msra.mxu0 %v852_v49 }
 0x302   : >> { %v870_v50 = vpop.trf.xlu0 }
 0x303   : >> { %2232 = vmatprep.mubr.msk.f32.mxu0 %vm886_vm1, %v870_v50 }
 0x306   : >> { %v871_v51 = vpop.trf.xlu0 }
 0x307   : >> { %2233 = vmatmul.mubr.msk.f32.vlgmr.msra.gmra.mxu0 %vm886_vm1, %v871_v51  ;;  %v1104_v51 = vld [vmem:[#allocation4 + $0x40] sm:$0xff] }
 0x30a   : >> { %v872_v52 = vpop.trf.xlu0 }
 0x30b   : >> { %2235 = vmatprep.mubr.msk.f32.mxu0 %vm886_vm1, %v872_v52 }
 0x30e   : >> { %v873_v53 = vpop.trf.xlu0 }
 0x30f   : >> { %2236 = vmatmul.mubr.msk.f32.gmra.mxu0 %vm886_vm1, %v873_v53 }
 0x312   : >> { %v874_v54 = vpop.trf.xlu0 }
 0x313   : >> { %2238 = vmatprep.mubr.msk.f32.mxu0 %vm886_vm1, %v874_v54  ;;  %v1103_v54 = vld [vmem:[#allocation4 + $0x38] sm:$0xff] }
 0x316   : >> { %v875_v55 = vpop.trf.xlu0 }
 0x317   : >> { %2239 = vmatmul.mubr.msk.f32.gmra.mxu0 %vm886_vm1, %v875_v55 }
 0x31a   : >> { %v876_v56 = vpop.trf.xlu0 }
 0x31b   : >> { %2241 = vmatprep.mubr.msk.f32.mxu0 %vm886_vm1, %v876_v56 }
 0x31e   : >> { %v877_v57 = vpop.trf.xlu0 }
 0x31f   : >> { %2242 = vmatmul.mubr.msk.f32.gmra.mxu0 %vm886_vm1, %v877_v57  ;;  %v1102_v57 = vld [vmem:[#allocation4 + $0x30] sm:$0xff] }
 0x322   : >> { %v878_v58 = vpop.trf.xlu0 }
 0x323   : >> { %2244 = vmatprep.mubr.msk.f32.mxu0 %vm886_vm1, %v878_v58 }
 0x326   : >> { %v879_v59 = vpop.trf.xlu0 }
 0x327   : >> { %2245 = vmatmul.mubr.msk.f32.gmra.mxu0 %vm886_vm1, %v879_v59 }
 0x32a   : >> { %v880_v60 = vpop.trf.xlu0 }
 0x32b   : >> { %2247 = vmatprep.mubr.msk.f32.mxu0 %vm886_vm1, %v880_v60  ;;  %v1101_v60 = vld [vmem:[#allocation4 + $0x28] sm:$0xff] }
 0x32e   : >> { %v881_v61 = vpop.trf.xlu0 }
 0x32f   : >> { %2248 = vmatmul.mubr.msk.f32.gmra.mxu0 %vm886_vm1, %v881_v61 }
 0x332   : >> { %v882_v62 = vpop.trf.xlu0 }
 0x333   : >> { %2250 = vmatprep.mubr.msk.f32.mxu0 %vm886_vm1, %v882_v62 }
 0x336   : >> { %v883_v63 = vpop.trf.xlu0 }
 0x337   : >> { %2251 = vmatmul.mubr.msk.f32.gmra.mxu0 %vm886_vm1, %v883_v63  ;;  %v1100_v63 = vld [vmem:[#allocation4 + $0x20] sm:$0xff] }
 0x33a   : >> { %v884_v0 = vpop.trf.xlu0 }
 0x33b   : >> { %2253 = vmatprep.mubr.msk.f32.mxu0 %vm886_vm1, %v884_v0 }
 0x33e   : >> { %v885_v1 = vpop.trf.xlu0 }
 0x33f   : >> { %2254 = vmatmul.mubr.msk.f32.gmra.mxu0 %vm886_vm1, %v885_v1 }
 0x3c7   : >> { %v3198_v2 = vpop.f32.mrf.mxu0 }
 0x3c9   : >> { %v3200_v3 = vpop.f32.mrf.mxu0 }
 0x3cf   : >> { %v2237_v9 = vpop.f32.mrf.mxu0 }
 0x3d0   : >> { %v1083_v0 = vmul.f32 0.5, %v2237_v9  ;;  %v1080_v9 = vmul.f32 0.5, %v3200_v3 }
 0x3d1   : >> { %v1011_v10 = vpop.f32.mrf.mxu0 }
 0x3d7   : >> { %v2240_v11 = vpop.f32.mrf.mxu0 }
 0x3d8   : >> { %v1085_v58 = vmul.f32 0.5, %v2240_v11  ;;  %v1098_v11 = vld [vmem:[#allocation4 + $0x10] sm:$0xff] }
 0x3d9   : >> { %v1021_v12 = vpop.f32.mrf.mxu0 }
 0x3da   : >> { %v1084_v61 = vmul.f32 0.5, %v1021_v12  ;;  %v3232_v62 = vadd.f32 %v1101_v60, %v1085_v58 }
 0x3dc   : >> { %v3235_v1 = vadd.f32 %v1100_v63, %v1084_v61 }
 0x3df   : >> { %v2243_v13 = vpop.f32.mrf.mxu0 }
 0x3e0   : >> { %v1087_v52 = vmul.f32 0.5, %v2243_v13  ;;  %v1099_v13 = vld [vmem:[#allocation4 + $0x18] sm:$0xff] }
 0x3e1   : >> { %v1031_v14 = vpop.f32.mrf.mxu0 }
 0x3e2   : >> { %v1086_v55 = vmul.f32 0.5, %v1031_v14  ;;  %v3226_v56 = vadd.f32 %v1103_v54, %v1087_v52  ;;  %v1082_v14 = vmul.f32 0.5, %v1011_v10 }
 0x3e4   : >> { %v3229_v59 = vadd.f32 %v1102_v57, %v1086_v55  ;;  %v3242_v12 = vadd.f32 %v1098_v11, %v1082_v14  ;;  %v2804_v11 = vmov 0.0  }
 0x3e5   : >> { %2256 = vmatprep.subr.mxu1 %v2804_v11  ;;  %2288 = vmatprep.mubr.msk.f32.mxu1 %vm2805_vm2, %v2804_v11 }
 0x3e7   : >> { %v2246_v15 = vpop.f32.mrf.mxu0 }
 0x3e8   : >> { %v1089_v46 = vmul.f32 0.5, %v2246_v15  ;;  %v3238_v15 = vadd.f32 %v1099_v13, %v1083_v0 }
 0x3e9   : >> { %v1041_v16 = vpop.f32.mrf.mxu0 }
 0x3ea   : >> { %v1088_v49 = vmul.f32 0.5, %v1041_v16  ;;  %v3220_v50 = vadd.f32 %v1105_v48, %v1089_v46  ;;  %v1081_v16 = vmul.f32 0.5, %v3198_v2 }
 0x3ec   : >> { %v3223_v53 = vadd.f32 %v1104_v51, %v1088_v49 }
 0x3ef   : >> { %v2249_v17 = vpop.f32.mrf.mxu0 }
 0x3f0   : >> { %v1091_v40 = vmul.f32 0.5, %v2249_v17  ;;  %v1097_v17 = vld [vmem:[#allocation4 + $0x8] sm:$0xff] }
 0x3f1   : >> { %v1051_v18 = vpop.f32.mrf.mxu0 }
 0x3f2   : >> { %v1090_v43 = vmul.f32 0.5, %v1051_v18  ;;  %v3214_v44 = vadd.f32 %v1107_v42, %v1091_v40  ;;  %v3246_v18 = vadd.f32 %v1097_v17, %v1081_v16 }
 0x3f4   : >> { %v3217_v47 = vadd.f32 %v1106_v45, %v1090_v43 }
 0x3f7   : >> { %v2252_v20 = vpop.f32.mrf.mxu0 }
 0x3f8   : >> { %v1093_v35 = vmul.f32 0.5, %v2252_v20  ;;  %v1096_v20 = vld [vmem:[#allocation4] sm:$0xff] }
 0x3f9   : >> { %v1061_v21 = vpop.f32.mrf.mxu0  ;;  %v3249_v10 = vadd.f32 %v1096_v20, %v1080_v9 }
 0x3fa   : >> { %v1092_v38 = vmul.f32 0.5, %v1061_v21  ;;  %v3208_v39 = vadd.f32 %v1109_v37, %v1093_v35 }
 0x3fc   : >> { %v3211_v41 = vadd.f32 %v1108_v19, %v1092_v38 }
 0x3ff   : >> { %v2255_v22 = vpop.f32.mrf.mxu0 }
 0x400   : >> { %v1095_v26 = vmul.f32 0.5, %v2255_v22 }
 0x401   : >> { %v1071_v28 = vpop.f32.mrf.mxu0 }
 0x402   : >> { %v1094_v33 = vmul.f32 0.5, %v1071_v28  ;;  %v3202_v34 = vadd.f32 %v1111_v24, %v1095_v26 }
 0x404   : >> { %1158 = vmax.xlane.f32.xlu0 %v3202_v34  ;;  %v3205_v36 = vadd.f32 %v1110_v32, %v1094_v33 }
 0x406   : >> { %1156 = vmax.xlane.f32.xlu1 %v3205_v36 }
 0x40a   : >> { %1154 = vmax.xlane.f32.xlu1 %v3208_v39 }
 0x40e   : >> { %1152 = vmax.xlane.f32.xlu1 %v3211_v41 }
 0x412   : >> { %1150 = vmax.xlane.f32.xlu1 %v3214_v44 }
 0x416   : >> { %1148 = vmax.xlane.f32.xlu1 %v3217_v47 }
 0x41a   : >> { %1146 = vmax.xlane.f32.xlu1 %v3220_v50 }
 0x41e   : >> { %1144 = vmax.xlane.f32.xlu1 %v3223_v53 }
 0x422   : >> { %1142 = vmax.xlane.f32.xlu1 %v3226_v56 }
 0x426   : >> { %1140 = vmax.xlane.f32.xlu1 %v3229_v59 }
 0x42a   : >> { %1138 = vmax.xlane.f32.xlu1 %v3232_v62 }
 0x42e   : >> { %1136 = vmax.xlane.f32.xlu1 %v3235_v1 }
 0x432   : >> { %1134 = vmax.xlane.f32.xlu1 %v3238_v15 }
 0x436   : >> { %1132 = vmax.xlane.f32.xlu1 %v3242_v12 }
 0x43a   : >> { %1130 = vmax.xlane.f32.xlu1 %v3246_v18 }
 0x43e   : >> { %1128 = vmax.xlane.f32.xlu1 %v3249_v10 }
 0x48d   : >> { %v1159_v21 = vpop.xlane.xlu0 %1158 }
 0x48e   : >> { %v1175_v22 = vsub.f32 %v3202_v34, %v1159_v21 }
 0x48f   : >> { %v1157_v2 = vpop.xlane.xlu1 %1156 }
 0x490   : >> { %v1206_v24 = vmul.f32 1.442695, %v1175_v22  ;;  %v1174_v26 = vsub.f32 %v3205_v36, %v1157_v2 }
 0x492   : >> { %2474 = vpow2.f32 %v1206_v24  ;;  %v1204_v28 = vmul.f32 1.442695, %v1174_v26 }
 0x493   : >> { %v1155_v32 = vpop.xlane.xlu1 %1154 }
 0x494   : >> { %v1173_v3 = vsub.f32 %v3208_v39, %v1155_v32  ;;  %2476 = vpow2.f32 %v1204_v28 }
 0x496   : >> { %v1202_v33 = vmul.f32 1.442695, %v1173_v3 }
 0x497   : >> { %v1153_v35 = vpop.xlane.xlu1 %1152 }
 0x498   : >> { %v1172_v37 = vsub.f32 %v3211_v41, %v1153_v35  ;;  %2478 = vpow2.f32 %v1202_v33 }
 0x49a   : >> { %v1200_v38 = vmul.f32 1.442695, %v1172_v37 }
 0x49b   : >> { %v1151_v19 = vpop.xlane.xlu1 %1150 }
 0x49c   : >> { %v1171_v40 = vsub.f32 %v3214_v44, %v1151_v19  ;;  %2480 = vpow2.f32 %v1200_v38 }
 0x49e   : >> { %v1198_v34 = vmul.f32 1.442695, %v1171_v40 }
 0x49f   : >> { %v3257_v42 = vpop.eup %2474  ;;  %v1149_v36 = vpop.xlane.xlu1 %1148 }
 0x4a0   : >> { %v1170_v43 = vsub.f32 %v3217_v47, %v1149_v36  ;;  %1238 = vadd.xlane.f32.xlu1 %v3257_v42  ;;  %2482 = vpow2.f32 %v1198_v34 }
 0x4a1   : >> { %v3261_v45 = vpop.eup %2476 }
 0x4a2   : >> { %v1196_v39 = vmul.f32 1.442695, %v1170_v43 }
 0x4a3   : >> { %v1147_v46 = vpop.xlane.xlu1 %1146 }
 0x4a4   : >> { %v1169_v41 = vsub.f32 %v3220_v50, %v1147_v46  ;;  %1236 = vadd.xlane.f32.xlu1 %v3261_v45  ;;  %2484 = vpow2.f32 %v1196_v39 }
 0x4a5   : >> { %v3265_v48 = vpop.eup %2478 }
 0x4a6   : >> { %v1194_v44 = vmul.f32 1.442695, %v1169_v41 }
 0x4a7   : >> { %v1145_v49 = vpop.xlane.xlu1 %1144 }
 0x4a8   : >> { %v1168_v51 = vsub.f32 %v3223_v53, %v1145_v49  ;;  %1234 = vadd.xlane.f32.xlu1 %v3265_v48  ;;  %2486 = vpow2.f32 %v1194_v44 }
 0x4a9   : >> { %v3269_v52 = vpop.eup %2480 }
 0x4aa   : >> { %v1192_v47 = vmul.f32 1.442695, %v1168_v51 }
 0x4ab   : >> { %v1143_v54 = vpop.xlane.xlu1 %1142 }
 0x4ac   : >> { %v1167_v55 = vsub.f32 %v3226_v56, %v1143_v54  ;;  %1232 = vadd.xlane.f32.xlu1 %v3269_v52  ;;  %2488 = vpow2.f32 %v1192_v47 }
 0x4ad   : >> { %v3273_v57 = vpop.eup %2482 }
 0x4ae   : >> { %v1190_v50 = vmul.f32 1.442695, %v1167_v55 }
 0x4af   : >> { %v1141_v58 = vpop.xlane.xlu1 %1140 }
 0x4b0   : >> { %v1166_v60 = vsub.f32 %v3229_v59, %v1141_v58  ;;  %1230 = vadd.xlane.f32.xlu1 %v3273_v57  ;;  %2490 = vpow2.f32 %v1190_v50 }
 0x4b1   : >> { %v3277_v61 = vpop.eup %2484 }
 0x4b2   : >> { %v1188_v53 = vmul.f32 1.442695, %v1166_v60 }
 0x4b3   : >> { %v1139_v63 = vpop.xlane.xlu1 %1138 }
 0x4b4   : >> { %v1165_v0 = vsub.f32 %v3232_v62, %v1139_v63  ;;  %1228 = vadd.xlane.f32.xlu1 %v3277_v61  ;;  %2492 = vpow2.f32 %v1188_v53 }
 0x4b5   : >> { %v3281_v13 = vpop.eup %2486 }
 0x4b6   : >> { %v1186_v56 = vmul.f32 1.442695, %v1165_v0 }
 0x4b7   : >> { %v1137_v14 = vpop.xlane.xlu1 %1136 }
 0x4b8   : >> { %v1164_v59 = vsub.f32 %v3235_v1, %v1137_v14  ;;  %1226 = vadd.xlane.f32.xlu1 %v3281_v13  ;;  %2494 = vpow2.f32 %v1186_v56 }
 0x4b9   : >> { %v3286_v17 = vpop.eup %2488 }
 0x4ba   : >> { %v1184_v16 = vmul.f32 1.442695, %v1164_v59 }
 0x4bb   : >> { %v1135_v9 = vpop.xlane.xlu1 %1134 }
 0x4bc   : >> { %v1163_v62 = vsub.f32 %v3238_v15, %v1135_v9  ;;  %1224 = vadd.xlane.f32.xlu1 %v3286_v17  ;;  %2496 = vpow2.f32 %v1184_v16 }
 0x4bd   : >> { %v3290_v21 = vpop.eup %2490 }
 0x4be   : >> { %v1182_v20 = vmul.f32 1.442695, %v1163_v62 }
 0x4bf   : >> { %v1133_v22 = vpop.xlane.xlu1 %1132 }
 0x4c0   : >> { %v1162_v2 = vsub.f32 %v3242_v12, %v1133_v22  ;;  %1222 = vadd.xlane.f32.xlu1 %v3290_v21  ;;  %2498 = vpow2.f32 %v1182_v20 }
 0x4c1   : >> { %v3294_v24 = vpop.eup %2492 }
 0x4c2   : >> { %v1180_v1 = vmul.f32 1.442695, %v1162_v2 }
 0x4c3   : >> { %v1131_v26 = vpop.xlane.xlu1 %1130 }
 0x4c4   : >> { %2500 = vpow2.f32 %v1180_v1  ;;  %v1161_v28 = vsub.f32 %v3246_v18, %v1131_v26  ;;  %1220 = vadd.xlane.f32.xlu1 %v3294_v24 }
 0x4c5   : >> { %v3298_v32 = vpop.eup %2494 }
 0x4c6   : >> { %v1178_v15 = vmul.f32 1.442695, %v1161_v28 }
 0x4c7   : >> { %v1129_v3 = vpop.xlane.xlu1 %1128 }
 0x4c8   : >> { %2502 = vpow2.f32 %v1178_v15  ;;  %v1160_v33 = vsub.f32 %v3249_v10, %v1129_v3  ;;  %1218 = vadd.xlane.f32.xlu1 %v3298_v32 }
 0x4c9   : >> { %v3302_v35 = vpop.eup %2496 }
 0x4ca   : >> { %v1176_v12 = vmul.f32 1.442695, %v1160_v33 }
 0x4cc   : >> { %2504 = vpow2.f32 %v1176_v12  ;;  %1216 = vadd.xlane.f32.xlu1 %v3302_v35 }
 0x4cd   : >> { %v3305_v37 = vpop.eup %2498 }
 0x4d0   : >> { %1214 = vadd.xlane.f32.xlu1 %v3305_v37 }
 0x4d1   : >> { %v3308_v18 = vpop.eup %2500 }
 0x4d2   : >> { %1212 = vadd.xlane.f32.xlu0 %v3308_v18 }
 0x4d5   : >> { %v3311_v38 = vpop.eup %2502 }
 0x4d6   : >> { %1210 = vadd.xlane.f32.xlu1 %v3311_v38 }
 0x4d9   : >> { %v3314_v10 = vpop.eup %2504 }
 0x4da   : >> { %1208 = vadd.xlane.f32.xlu0 %v3314_v10 }
 0x529   : >> { %v1239_v19 = vpop.xlane.xlu1 %1238 }
 0x52a   : >> { %2506 = vrcp.f32 %v1239_v19 }
 0x52d   : >> { %v1237_v40 = vpop.xlane.xlu1 %1236 }
 0x52e   : >> { %2508 = vrcp.f32 %v1237_v40  ;;  %v1358_v40 = vld [vmem:[%s3037_s17 + $0x60] sm:$0xff] (%p841_p11) }
 0x531   : >> { %v1235_v34 = vpop.xlane.xlu1 %1234 }
 0x532   : >> { %2510 = vrcp.f32 %v1235_v34 }
 0x535   : >> { %v1233_v36 = vpop.xlane.xlu1 %1232 }
 0x536   : >> { %2512 = vrcp.f32 %v1233_v36  ;;  %v1357_v36 = vld [vmem:[%s3037_s17 + $0x58] sm:$0xff] (%p841_p11) }
 0x537   : >> { %v2507_v43 = vpop.eup %2506 }
 0x538   : >> { %v1271_v39 = vmul.f32 %v2507_v43, %v3257_v42  ;;  %v1356_v43 = vld [vmem:[%s3037_s17 + $0x50] sm:$0xff] (%p841_p11) }
 0x539   : >> { %v1231_v46 = vpop.xlane.xlu1 %1230 }
 0x53a   : >> { %2514 = vrcp.f32 %v1231_v46  ;;  %2257 = vmatpush3.xpose.msra.mxu1 %v1271_v39  ;;  %v1355_v39 = vld [vmem:[%s3037_s17 + $0x48] sm:$0xff] (%p841_p11)  ;;  %v1354_v46 = vld [vmem:[%s3037_s17 + $0x40] sm:$0xff] (%p841_p11) }
 0x53b   : >> { %v2509_v41 = vpop.eup %2508  ;;  %2258 = vmatprep.subr.mxu1 %v2804_v11 }
 0x53c   : >> { %v1270_v44 = vmul.f32 %v2509_v41, %v3261_v45  ;;  %v1353_v41 = vld [vmem:[%s3037_s17 + $0x38] sm:$0xff] (%p841_p11) }
 0x53d   : >> { %v1229_v49 = vpop.xlane.xlu1 %1228 }
 0x53e   : >> { %2516 = vrcp.f32 %v1229_v49  ;;  %2259 = vmatpush3.xpose.msra.mxu1 %v1270_v44  ;;  %v1352_v44 = vld [vmem:[%s3037_s17 + $0x30] sm:$0xff] (%p841_p11)  ;;  %v1351_v49 = vld [vmem:[%s3037_s17 + $0x28] sm:$0xff] (%p841_p11) }
 0x53f   : >> { %v2511_v51 = vpop.eup %2510  ;;  %2260 = vmatprep.subr.mxu1 %v2804_v11 }
 0x540   : >> { %v1269_v47 = vmul.f32 %v2511_v51, %v3265_v48  ;;  %v1350_v51 = vld [vmem:[%s3037_s17 + $0x20] sm:$0xff] (%p841_p11) }
 0x541   : >> { %v1227_v54 = vpop.xlane.xlu1 %1226 }
 0x542   : >> { %2518 = vrcp.f32 %v1227_v54  ;;  %2261 = vmatpush3.xpose.msra.mxu1 %v1269_v47  ;;  %v1349_v47 = vld [vmem:[%s3037_s17 + $0x18] sm:$0xff] (%p841_p11)  ;;  %v1348_v54 = vld [vmem:[%s3037_s17 + $0x10] sm:$0xff] (%p841_p11) }
 0x543   : >> { %v2513_v42 = vpop.eup %2512  ;;  %2262 = vmatprep.subr.mxu1 %v2804_v11 }
 0x544   : >> { %v1268_v55 = vmul.f32 %v2513_v42, %v3269_v52  ;;  %v1347_v42 = vld [vmem:[%s3037_s17 + $0x8] sm:$0xff] (%p841_p11) }
 0x545   : >> { %v1225_v50 = vpop.xlane.xlu1 %1224 }
 0x546   : >> { %2520 = vrcp.f32 %v1225_v50  ;;  %2263 = vmatpush3.xpose.msra.mxu1 %v1268_v55  ;;  %v1346_v55 = vld [vmem:[%s3037_s17] sm:$0xff] (%p841_p11) }
 0x547   : >> { %v2515_v45 = vpop.eup %2514  ;;  %2264 = vmatprep.subr.mxu1 %v2804_v11 }
 0x548   : >> { %v1267_v58 = vmul.f32 %v2515_v45, %v3273_v57 }
 0x549   : >> { %v1223_v60 = vpop.xlane.xlu1 %1222 }
 0x54a   : >> { %2522 = vrcp.f32 %v1223_v60  ;;  %2265 = vmatpush3.xpose.msra.mxu1 %v1267_v58 }
 0x54b   : >> { %v2517_v48 = vpop.eup %2516  ;;  %2266 = vmatprep.subr.mxu1 %v2804_v11 }
 0x54c   : >> { %v1266_v53 = vmul.f32 %v2517_v48, %v3277_v61 }
 0x54d   : >> { %v1221_v63 = vpop.xlane.xlu1 %1220 }
 0x54e   : >> { %2524 = vrcp.f32 %v1221_v63  ;;  %2267 = vmatpush3.xpose.msra.mxu1 %v1266_v53 }
 0x54f   : >> { %v2519_v52 = vpop.eup %2518  ;;  %2268 = vmatprep.subr.mxu1 %v2804_v11 }
 0x550   : >> { %v1265_v0 = vmul.f32 %v2519_v52, %v3281_v13  ;;  %v1510_v52 = vld [vmem:[%s3039_s19 + $0xf8] sm:$0xff] (%p841_p11) }
 0x551   : >> { %v1219_v56 = vpop.xlane.xlu1 %1218 }
 0x552   : >> { %2526 = vrcp.f32 %v1219_v56  ;;  %2269 = vmatpush3.xpose.msra.mxu1 %v1265_v0  ;;  %v1509_v0 = vld [vmem:[%s3039_s19 + $0xf0] sm:$0xff] (%p841_p11)  ;;  %v1508_v56 = vld [vmem:[%s3039_s19 + $0xe8] sm:$0xff] (%p841_p11) }
 0x553   : >> { %v2521_v57 = vpop.eup %2520  ;;  %2270 = vmatprep.subr.mxu1 %v2804_v11 }
 0x554   : >> { %v1264_v14 = vmul.f32 %v2521_v57, %v3286_v17  ;;  %v1507_v57 = vld [vmem:[%s3039_s19 + $0xe0] sm:$0xff] (%p841_p11) }
 0x555   : >> { %v1217_v59 = vpop.xlane.xlu1 %1216 }
 0x556   : >> { %2528 = vrcp.f32 %v1217_v59  ;;  %2271 = vmatpush3.xpose.msra.mxu1 %v1264_v14  ;;  %v1506_v14 = vld [vmem:[%s3039_s19 + $0xd8] sm:$0xff] (%p841_p11)  ;;  %v1505_v59 = vld [vmem:[%s3039_s19 + $0xd0] sm:$0xff] (%p841_p11) }
 0x557   : >> { %v2523_v61 = vpop.eup %2522  ;;  %2272 = vmatprep.subr.mxu1 %v2804_v11 }
 0x558   : >> { %v1263_v16 = vmul.f32 %v2523_v61, %v3290_v21  ;;  %v1504_v61 = vld [vmem:[%s3039_s19 + $0xc8] sm:$0xff] (%p841_p11) }
 0x559   : >> { %v1215_v9 = vpop.xlane.xlu1 %1214 }
 0x55a   : >> { %2530 = vrcp.f32 %v1215_v9  ;;  %2273 = vmatpush3.xpose.msra.mxu1 %v1263_v16 }
 0x55b   : >> { %v2525_v13 = vpop.eup %2524  ;;  %v1213_v62 = vpop.xlane.xlu0 %1212  ;;  %2274 = vmatprep.subr.mxu1 %v2804_v11 }
 0x55c   : >> { %2532 = vrcp.f32 %v1213_v62  ;;  %v1262_v20 = vmul.f32 %v2525_v13, %v3294_v24 }
 0x55e   : >> { %2275 = vmatpush3.xpose.msra.mxu1 %v1262_v20 }
 0x55f   : >> { %v2527_v17 = vpop.eup %2526  ;;  %v1211_v22 = vpop.xlane.xlu1 %1210  ;;  %2276 = vmatprep.subr.mxu1 %v2804_v11 }
 0x560   : >> { %2534 = vrcp.f32 %v1211_v22  ;;  %v1261_v2 = vmul.f32 %v2527_v17, %v3298_v32 }
 0x562   : >> { %2277 = vmatpush3.xpose.msra.mxu1 %v1261_v2 }
 0x563   : >> { %v2529_v21 = vpop.eup %2528  ;;  %v1209_v1 = vpop.xlane.xlu0 %1208  ;;  %2278 = vmatprep.subr.mxu1 %v2804_v11 }
 0x564   : >> { %2536 = vrcp.f32 %v1209_v1  ;;  %v1260_v26 = vmul.f32 %v2529_v21, %v3302_v35  ;;  %v1502_v21 = vld [vmem:[%s3039_s19 + $0xb8] sm:$0xff] (%p841_p11)  ;;  %v1501_v1 = vld [vmem:[%s3039_s19 + $0xb0] sm:$0xff] (%p841_p11) }
 0x566   : >> { %2279 = vmatpush3.xpose.msra.mxu1 %v1260_v26  ;;  %v1500_v26 = vld [vmem:[%s3039_s19 + $0xa8] sm:$0xff] (%p841_p11) }
 0x567   : >> { %v2531_v28 = vpop.eup %2530  ;;  %2280 = vmatprep.subr.mxu1 %v2804_v11 }
 0x568   : >> { %v1259_v24 = vmul.f32 %v2531_v28, %v3305_v37  ;;  %v853_v37 = vld [vmem:[%s3178_s23 + $0x10] sm:$0xff]  ;;  %v1499_v28 = vld [vmem:[%s3039_s19 + $0xa0] sm:$0xff] (%p841_p11) }
 0x569   : >> { %v2533_v15 = vpop.eup %2532 }
 0x56a   : >> { %2281 = vmatpush3.xpose.msra.mxu1 %v1259_v24  ;;  %v1258_v32 = vmul.f32 %v2533_v15, %v3308_v18  ;;  %v1497_v24 = vld [vmem:[%s3039_s19 + $0x90] sm:$0xff] (%p841_p11)  ;;  %v1496_v15 = vld [vmem:[%s3039_s19 + $0x88] sm:$0xff] (%p841_p11) }
 0x56b   : >> { %2282 = vmatprep.subr.mxu1 %v2804_v11 }
 0x56d   : >> { %v2535_v3 = vpop.eup %2534 }
 0x56e   : >> { %2283 = vmatpush3.xpose.msra.mxu1 %v1258_v32  ;;  %v1257_v33 = vmul.f32 %v2535_v3, %v3311_v38  ;;  %v1360_v38 = vld [vmem:[%s3037_s17 + $0x70] sm:$0xff] (%p841_p11)  ;;  %v1495_v32 = vld [vmem:[%s3039_s19 + $0x80] sm:$0xff] (%p841_p11)  ;;  %v1494_v3 = vld [vmem:[%s3039_s19 + $0x78] sm:$0xff] (%p841_p11) }
 0x56f   : >> { %2284 = vmatprep.subr.mxu1 %v2804_v11 }
 0x571   : >> { %v2537_v12 = vpop.eup %2536 }
 0x572   : >> { %2285 = vmatpush3.xpose.msra.mxu1 %v1257_v33  ;;  %v1256_v35 = vmul.f32 %v2537_v12, %v3314_v10  ;;  %v1359_v10 = vld [vmem:[%s3037_s17 + $0x68] sm:$0xff] (%p841_p11)  ;;  %v1493_v33 = vld [vmem:[%s3039_s19 + $0x70] sm:$0xff] (%p841_p11) }
 0x573   : >> { %2286 = vmatprep.subr.mxu1 %v2804_v11  ;;  %v1361_v11 = vld [vmem:[%s3037_s17 + $0x78] sm:$0xff] (%p841_p11)  ;;  %v1492_v12 = vld [vmem:[%s3039_s19 + $0x68] sm:$0xff] (%p841_p11)  ;;  %s2807_s17 = smov (%p841_p11), [#allocation13]  }
 0x574   : > { %2291 = vmatprep.subr.mxu0 (%p841_p11), %v1361_v11 }
 0x575   : > { %2292 = vmatpush3.msra.mxu0 (%p841_p11), %v1361_v11  ;;  %v1487_v11 = vld [vmem:[%s3039_s19 + $0x40] sm:$0xff] (%p841_p11) }
 0x576   : >> { %2287 = vmatpush3.xpose.msra.mxu1 %v1256_v35  ;;  %2293 = vmatprep.subr.mxu0 (%p841_p11), %v1360_v38  ;;  %v1491_v35 = vld [vmem:[%s3039_s19 + $0x60] sm:$0xff] (%p841_p11) }
 0x577   : > { %2294 = vmatpush3.msra.mxu0 (%p841_p11), %v1360_v38  ;;  %1523 = vmatprep.subr.mxu1 (%p841_p11), %v1510_v52  ;;  %v1486_v38 = vld [vmem:[%s3039_s19 + $0x38] sm:$0xff] (%p841_p11) }
 0x578   : > { %2295 = vmatprep.subr.mxu0 (%p841_p11), %v1359_v10  ;;  %v1723_v52 = vld [vmem:[%s3062_s21 + $0x78] sm:$0xff] (%p841_p11) }
 0x579   : >> { %2289 = vmatmul.mubr.f32.vlgmr.msra.gmra.mxu1 %v853_v37  ;;  %2296 = vmatpush3.msra.mxu0 (%p841_p11), %v1359_v10  ;;  %v1490_v37 = vld [vmem:[%s3039_s19 + $0x58] sm:$0xff] (%p841_p11)  ;;  %v1485_v10 = vld [vmem:[%s3039_s19 + $0x30] sm:$0xff] (%p841_p11) }
 0x57a   : > { %1587 = vmatprep.mubr.f32.mxu1 (%p841_p11), %v2803_v4  ;;  %2297 = vmatprep.subr.mxu0 (%p841_p11), %v1358_v40 }
 0x57b   : > { %2298 = vmatpush3.msra.mxu0 (%p841_p11), %v1358_v40  ;;  %1524 = vmatpush1.msra.mxu1 (%p841_p11), %v1509_v0  ;;  %v1484_v40 = vld [vmem:[%s3039_s19 + $0x28] sm:$0xff] (%p841_p11)  ;;  %v1738_v0 = vld [vmem:[%s3062_s21 + $0xf0] sm:$0xff] (%p841_p11) }
 0x57c   : > { %2299 = vmatprep.subr.mxu0 (%p841_p11), %v1357_v36  ;;  %1525 = vmatprep.subr.mxu1 (%p841_p11), %v1508_v56  ;;  %v1736_v56 = vld [vmem:[%s3062_s21 + $0xe0] sm:$0xff] (%p841_p11) }
 0x57d   : > { %2300 = vmatpush3.msra.mxu0 (%p841_p11), %v1357_v36  ;;  %1526 = vmatpush1.msra.mxu1 (%p841_p11), %v1507_v57  ;;  %v1482_v36 = vld [vmem:[%s3039_s19 + $0x18] sm:$0xff] (%p841_p11)  ;;  %v1720_v57 = vld [vmem:[%s3062_s21 + $0x60] sm:$0xff] (%p841_p11) }
 0x57e   : > { %2301 = vmatprep.subr.mxu0 (%p841_p11), %v1356_v43  ;;  %1527 = vmatprep.subr.mxu1 (%p841_p11), %v1506_v14  ;;  %v1735_v14 = vld [vmem:[%s3062_s21 + $0xd8] sm:$0xff] (%p841_p11) }
 0x57f   : > { %2302 = vmatpush3.msra.mxu0 (%p841_p11), %v1356_v43  ;;  %1528 = vmatpush1.msra.mxu1 (%p841_p11), %v1505_v59  ;;  %v1481_v43 = vld [vmem:[%s3039_s19 + $0x10] sm:$0xff] (%p841_p11)  ;;  %v1719_v59 = vld [vmem:[%s3062_s21 + $0x58] sm:$0xff] (%p841_p11) }
 0x580   : > { %2303 = vmatprep.subr.mxu0 (%p841_p11), %v1355_v39  ;;  %1529 = vmatprep.subr.mxu1 (%p841_p11), %v1504_v61  ;;  %v1734_v61 = vld [vmem:[%s3062_s21 + $0xd0] sm:$0xff] (%p841_p11) }
 0x581   : > { %2304 = vmatpush3.msra.mxu0 (%p841_p11), %v1355_v39  ;;  %v1480_v39 = vld [vmem:[%s3039_s19 + $0x8] sm:$0xff] (%p841_p11) }
 0x582   : > { %2305 = vmatprep.subr.mxu0 (%p841_p11), %v1354_v46 }
 0x583   : > { %2306 = vmatpush3.msra.mxu0 (%p841_p11), %v1354_v46  ;;  %v1479_v46 = vld [vmem:[%s3039_s19] sm:$0xff] (%p841_p11) }
 0x584   : > { %2307 = vmatprep.subr.mxu0 (%p841_p11), %v1353_v41 }
 0x585   : > { %2308 = vmatpush3.msra.mxu0 (%p841_p11), %v1353_v41 }
 0x586   : > { %2309 = vmatprep.subr.mxu0 (%p841_p11), %v1352_v44 }
 0x587   : > { %2310 = vmatpush3.msra.mxu0 (%p841_p11), %v1352_v44 }
 0x588   : > { %2311 = vmatprep.subr.mxu0 (%p841_p11), %v1351_v49 }
 0x589   : > { %2312 = vmatpush3.msra.mxu0 (%p841_p11), %v1351_v49 }
 0x58a   : > { %2313 = vmatprep.subr.mxu0 (%p841_p11), %v1350_v51 }
 0x58b   : > { %2314 = vmatpush3.msra.mxu0 (%p841_p11), %v1350_v51 }
 0x58c   : > { %2315 = vmatprep.subr.mxu0 (%p841_p11), %v1349_v47 }
 0x58d   : > { %2316 = vmatpush3.msra.mxu0 (%p841_p11), %v1349_v47 }
 0x58e   : > { %2317 = vmatprep.subr.mxu0 (%p841_p11), %v1348_v54 }
 0x58f   : > { %2318 = vmatpush3.msra.mxu0 (%p841_p11), %v1348_v54 }
 0x590   : > { %2319 = vmatprep.subr.mxu0 (%p841_p11), %v1347_v42 }
 0x591   : > { %2320 = vmatpush3.msra.mxu0 (%p841_p11), %v1347_v42 }
 0x592   : > { %2321 = vmatprep.subr.mxu0 (%p841_p11), %v1346_v55 }
 0x593   : > { %2322 = vmatpush3.msra.mxu0 (%p841_p11), %v1346_v55 }
 0x637   : > { %843 = sbr.rel (!%p841_p11) target bundleno = 639 (0x27f), region = 159 }
 0x639   : >> { %v1338_v19 = vpop.f32.mrf.mxu1 }
 0x63a   : >> { %1343 = vst [vmem:[%s1342_s6] sm:$0xff] %v1338_v19  ;;  %v1489_v19 = vld [vmem:[%s3039_s19 + $0x50] sm:$0xff] (%p841_p11) }
 0x63b   : >> { %v2290_v18 = vpop.f32.mrf.mxu1 }
 0x63c   : > { %v1488_v18 = vld [vmem:[%s3039_s19 + $0x48] sm:$0xff] }
 0x641   : > { %v1344_v34 = vld [vmem:[#allocation3] sm:$0xff]  ;;  %v1345_v50 = vld [vmem:[#allocation3 + $0x8] sm:$0xff] }
 0x642   : > { %2323 = vmatprep.mubr.f32.mxu0 %v1344_v34  ;;  %v1483_v34 = vld [vmem:[%s3039_s19 + $0x20] sm:$0xff] }
 0x643   : > { %2324 = vmatmul.mubr.f32.vlgmr.msra.gmra.mxu0 %v1345_v50 }
 0x703   : > { %v2325_v45 = vpop.f32.mrf.mxu0 }
 0x704   : > { %v1438_v48 = vadd.f32 %v2325_v45, %v3073_v5 }
 0x705   : > { %v1432_v58 = vpop.f32.mrf.mxu0 }
 0x706   : > { %v1433_v60 = vadd.f32 %v3073_v5, %v1432_v58  ;;  %v1442_v63 = vadd.f32 %v1438_v48, %v3155_v29  ;;  %v1503_v5 = vld [vmem:[%s3039_s19 + $0xc0] sm:$0xff] }
 0x707   : > { %1530 = vmatpush1.msra.mxu1 %v1503_v5  ;;  %v1718_v5 = vld [vmem:[%s3062_s21 + $0x50] sm:$0xff] }
 0x708   : > { %v1441_v53 = vadd.f32 %v1433_v60, %v3149_v25  ;;  %1531 = vmatprep.subr.mxu1 %v1502_v21  ;;  %v1728_v21 = vld [vmem:[%s3062_s21 + $0xa0] sm:$0xff] }
 0x709   : > { %1532 = vmatpush1.msra.mxu1 %v1501_v1  ;;  %v1712_v1 = vld [vmem:[%s3062_s21 + $0x20] sm:$0xff] }
 0x70a   : > { %1443 = vadd.xlane.f32.xlu0 %v1441_v53  ;;  %1533 = vmatprep.subr.mxu1 %v1500_v26  ;;  %v1727_v26 = vld [vmem:[%s3062_s21 + $0x98] sm:$0xff] }
 0x70b   : > { %1534 = vmatpush1.msra.mxu1 %v1499_v28  ;;  %v1711_v28 = vld [vmem:[%s3062_s21 + $0x18] sm:$0xff] }
 0x70e   : > { %1445 = vadd.xlane.f32.xlu0 %v1442_v63 }
 0x793   : > { %v1444_v25 = vpop.xlane.xlu0 %1443 }
 0x794   : > { %v1447_v29 = vmul.f32 0.025, %v1444_v25  ;;  %v1733_v25 = vld [vmem:[%s3062_s21 + $0xc8] sm:$0xff] }
 0x796   : > { %v1449_v16 = vsub.f32 %v1441_v53, %v1447_v29  ;;  %v1717_v29 = vld [vmem:[%s3062_s21 + $0x48] sm:$0xff] }
 0x797   : > { %v1446_v9 = vpop.xlane.xlu0 %1445 }
 0x798   : > { %v1448_v13 = vmul.f32 0.025, %v1446_v9  ;;  %v3385_v62 = vmul.f32 %v3096_v23, %v1449_v16  ;;  %v1732_v16 = vld [vmem:[%s3062_s21 + $0xc0] sm:$0xff] }
 0x799   : > { %v1716_v9 = vld [vmem:[%s3062_s21 + $0x40] sm:$0xff] }
 0x79a   : > { %v1450_v20 = vsub.f32 %v1442_v63, %v1448_v13  ;;  %v1453_v17 = vmul.f32 %v3385_v62, %v3385_v62  ;;  %v1739_v63 = vld [vmem:[%s3062_s21 + $0xf8] sm:$0xff] }
 0x79b   : > { %2157 = vmatprep.subr.mxu0 %v1739_v63  ;;  %v1731_v13 = vld [vmem:[%s3062_s21 + $0xb8] sm:$0xff] }
 0x79c   : > { %v3390_v22 = vmul.f32 %v3096_v23, %v1450_v20  ;;  %1455 = vadd.xlane.f32.xlu1 %v1453_v17  ;;  %v1498_v23 = vld [vmem:[%s3039_s19 + $0x98] sm:$0xff]  ;;  %2158 = vmatpush3.msra.mxu0 %v1723_v52  ;;  %v1730_v20 = vld [vmem:[%s3062_s21 + $0xb0] sm:$0xff]  ;;  %s1832_s19 = sshll.u32 %s2807_s17, 4  ;;  %s1833_s19 = int_to_ptr.vmem [resolvable:$true] %s1832_s19 }
 0x79d   : > { %1535 = vmatprep.subr.mxu1 %v1498_v23  ;;  %2159 = vmatprep.subr.mxu0 %v1738_v0  ;;  %v1714_v17 = vld [vmem:[%s3062_s21 + $0x30] sm:$0xff]  ;;  %s2696_s28 = scalar_lea.vmem %s1833_s19, 256  ;;  %p2703_p3 = scmp.lt.s32.totalorder %s1833_s19, %s1833_s19 }
 0x79e   : > { %v1454_v2 = vmul.f32 %v3390_v22, %v3390_v22  ;;  %1536 = vmatpush1.msra.mxu1 %v1497_v24  ;;  %v1726_v23 = vld [vmem:[%s3062_s21 + $0x90] sm:$0xff]  ;;  %p2697_p1 = scmp.ne.s32.totalorder %s1833_s19, %s2696_s28  ;;  %p2704_p2 = scmp.lt.s32.totalorder %s2696_s28, %s2696_s28 }
 0x79f   : > { %1537 = vmatprep.subr.mxu1 %v1496_v15  ;;  %v1710_v24 = vld [vmem:[%s3062_s21 + $0x10] sm:$0xff]  ;;  %v1725_v15 = vld [vmem:[%s3062_s21 + $0x88] sm:$0xff] }
 0x7a0   : > { %1457 = vadd.xlane.f32.xlu1 %v1454_v2  ;;  %1538 = vmatpush1.msra.mxu1 %v1495_v32  ;;  %v1713_v2 = vld [vmem:[%s3062_s21 + $0x28] sm:$0xff]  ;;  %p2698_p12 = pnand %p2697_p1, %p2398_p0  ;;  %p2705_p4 = por %p2704_p2, %p2703_p3 }
 0x7a1   : > { %1539 = vmatprep.subr.mxu1 %v1494_v3  ;;  %v1709_v32 = vld [vmem:[%s3062_s21 + $0x8] sm:$0xff]  ;;  %v1724_v3 = vld [vmem:[%s3062_s21 + $0x80] sm:$0xff] }
 0x7a2   : > { %1540 = vmatpush1.msra.mxu1 %v1493_v33  ;;  %v1708_v33 = vld [vmem:[%s3062_s21] sm:$0xff]  ;;  %p2699_p13 = pneg %p2698_p12 }
 0x7a3   : > { %1541 = vmatprep.subr.mxu1 %v1492_v12  ;;  %v1511_v12 = vld [vmem:[%s3060_s11] sm:$0x3] }
 0x7a4   : > { %1542 = vmatpush1.msra.mxu1 %v1491_v35  ;;  %v1516_v35 = vrot.slane %v1511_v12, %v668_v31  ;;  %p2706_p5 = pnand %p2705_p4, %p2699_p13 }
 0x7a5   : > { %1543 = vmatprep.subr.mxu1 %v1490_v37  ;;  %v1520_v37 = vrot.slane %v1511_v12, %v672_v30 }
 0x7a6   : > { %1544 = vmatpush1.msra.mxu1 %v1489_v19 }
 0x7a7   : > { %1545 = vmatprep.subr.mxu1 %v1488_v18 }
 0x7a8   : > { %1546 = vmatpush1.msra.mxu1 %v1487_v11 }
 0x7a9   : > { %1547 = vmatprep.subr.mxu1 %v1486_v38 }
 0x7aa   : > { %1548 = vmatpush1.msra.mxu1 %v1485_v10 }
 0x7ab   : > { %1549 = vmatprep.subr.mxu1 %v1484_v40 }
 0x7ac   : > { %1550 = vmatpush1.msra.mxu1 %v1483_v34 }
 0x7ad   : > { %1551 = vmatprep.subr.mxu1 %v1482_v36 }
 0x7ae   : > { %1552 = vmatpush1.msra.mxu1 %v1481_v43 }
 0x7af   : > { %1553 = vmatprep.subr.mxu1 %v1480_v39 }
 0x7b0   : > { %1554 = vmatpush1.msra.mxu1 %v1479_v46 }
 0x7b1   : > { %2326 = vmatprep.subr.mxu1 %v1739_v63 }
 0x825   : > { %v1456_v41 = vpop.xlane.xlu1 %1455 }
 0x826   : > { %v1459_v44 = vmul.f32 0.025, %v1456_v41 }
 0x828   : > { %v1461_v49 = vadd.f32 1e-05, %v1459_v44 }
 0x829   : > { %v1458_v51 = vpop.xlane.xlu1 %1457 }
 0x82a   : > { %2538 = vrsqrt.f32 %v1461_v49  ;;  %v1460_v47 = vmul.f32 0.025, %v1458_v51 }
 0x82c   : > { %v1462_v54 = vadd.f32 1e-05, %v1460_v47 }
 0x82e   : > { %2540 = vrsqrt.f32 %v1462_v54 }
 0x837   : > { %v2539_v42 = vpop.eup %2538 }
 0x838   : > { %v1465_v55 = vmul.f32 %v2539_v42, %v3385_v62  ;;  %v1715_v62 = vld [vmem:[%s3062_s21 + $0x38] sm:$0xff] }
 0x83a   : > { %v1471_v50 = vmul.f32 %v3076_v6, %v1465_v55 }
 0x83b   : > { %v2541_v45 = vpop.eup %2540 }
 0x83c   : > { %v3421_v58 = vadd.f32 %v3079_v7, %v1471_v50  ;;  %v1466_v60 = vmul.f32 %v2541_v45, %v3390_v22  ;;  %v1729_v22 = vld [vmem:[%s3062_s21 + $0xa8] sm:$0xff] }
 0x83e   : > { %1588 = vmatmul.mubr.f32.vlgmr.msra.gmra.mxu1 %v3421_v58  ;;  %v1472_v48 = vmul.f32 %v3076_v6, %v1466_v60  ;;  %v1722_v6 = vld [vmem:[%s3062_s21 + $0x70] sm:$0xff] }
 0x83f   : > { %1593 = vmatprep.mubr.f32.mxu1 %v2803_v4  ;;  %2342 = vmatpush3.msra.mxu1 %v1723_v52  ;;  %v1737_v4 = vld [vmem:[%s3062_s21 + $0xe8] sm:$0xff] }
 0x840   : > { %v3428_v53 = vadd.f32 %v3079_v7, %v1472_v48  ;;  %2327 = vmatprep.subr.mxu1 %v1738_v0  ;;  %2160 = vmatpush3.msra.mxu0 %v1722_v6  ;;  %v1721_v7 = vld [vmem:[%s3062_s21 + $0x68] sm:$0xff] }
 0x841   : > { %2343 = vmatpush3.msra.mxu1 %v1722_v6  ;;  %2161 = vmatprep.subr.mxu0 %v1737_v4 }
 0x842   : > { %1594 = vmatmul.mubr.f32.gmra.mxu1 %v3428_v53  ;;  %2328 = vmatprep.subr.mxu1 %v1737_v4 }
 0x843   : > { %2162 = vmatpush3.msra.mxu0 %v1721_v7  ;;  %2344 = vmatpush3.msra.mxu1 %v1721_v7 }
 0x844   : > { %2163 = vmatprep.subr.mxu0 %v1736_v56  ;;  %2329 = vmatprep.subr.mxu1 %v1736_v56 }
 0x845   : > { %2164 = vmatpush3.msra.mxu0 %v1720_v57  ;;  %2345 = vmatpush3.msra.mxu1 %v1720_v57 }
 0x846   : > { %2165 = vmatprep.subr.mxu0 %v1735_v14  ;;  %2330 = vmatprep.subr.mxu1 %v1735_v14 }
 0x847   : > { %2166 = vmatpush3.msra.mxu0 %v1719_v59  ;;  %2346 = vmatpush3.msra.mxu1 %v1719_v59 }
 0x848   : > { %2167 = vmatprep.subr.mxu0 %v1734_v61  ;;  %2331 = vmatprep.subr.mxu1 %v1734_v61 }
 0x849   : > { %2168 = vmatpush3.msra.mxu0 %v1718_v5  ;;  %2347 = vmatpush3.msra.mxu1 %v1718_v5 }
 0x84a   : > { %2169 = vmatprep.subr.mxu0 %v1733_v25  ;;  %2332 = vmatprep.subr.mxu1 %v1733_v25 }
 0x84b   : > { %2170 = vmatpush3.msra.mxu0 %v1717_v29  ;;  %2348 = vmatpush3.msra.mxu1 %v1717_v29 }
 0x84c   : > { %2171 = vmatprep.subr.mxu0 %v1732_v16  ;;  %2333 = vmatprep.subr.mxu1 %v1732_v16 }
 0x84d   : > { %2172 = vmatpush3.msra.mxu0 %v1716_v9  ;;  %2349 = vmatpush3.msra.mxu1 %v1716_v9 }
 0x84e   : > { %2173 = vmatprep.subr.mxu0 %v1731_v13  ;;  %2334 = vmatprep.subr.mxu1 %v1731_v13 }
 0x84f   : > { %2174 = vmatpush3.msra.mxu0 %v1715_v62  ;;  %2350 = vmatpush3.msra.mxu1 %v1715_v62 }
 0x850   : > { %2175 = vmatprep.subr.mxu0 %v1730_v20  ;;  %2335 = vmatprep.subr.mxu1 %v1730_v20 }
 0x851   : > { %2176 = vmatpush3.msra.mxu0 %v1714_v17  ;;  %2351 = vmatpush3.msra.mxu1 %v1714_v17 }
 0x852   : > { %2177 = vmatprep.subr.mxu0 %v1729_v22  ;;  %2336 = vmatprep.subr.mxu1 %v1729_v22 }
 0x853   : > { %2178 = vmatpush3.msra.mxu0 %v1713_v2  ;;  %2352 = vmatpush3.msra.mxu1 %v1713_v2 }
 0x854   : > { %2179 = vmatprep.subr.mxu0 %v1728_v21  ;;  %2337 = vmatprep.subr.mxu1 %v1728_v21 }
 0x855   : > { %2180 = vmatpush3.msra.mxu0 %v1712_v1  ;;  %2353 = vmatpush3.msra.mxu1 %v1712_v1 }
 0x856   : > { %2181 = vmatprep.subr.mxu0 %v1727_v26  ;;  %2338 = vmatprep.subr.mxu1 %v1727_v26 }
 0x857   : > { %2182 = vmatpush3.msra.mxu0 %v1711_v28  ;;  %2354 = vmatpush3.msra.mxu1 %v1711_v28 }
 0x858   : > { %2183 = vmatprep.subr.mxu0 %v1726_v23  ;;  %2339 = vmatprep.subr.mxu1 %v1726_v23 }
 0x859   : > { %2184 = vmatpush3.msra.mxu0 %v1710_v24  ;;  %2355 = vmatpush3.msra.mxu1 %v1710_v24 }
 0x85a   : > { %2185 = vmatprep.subr.mxu0 %v1725_v15  ;;  %2340 = vmatprep.subr.mxu1 %v1725_v15 }
 0x85b   : > { %2186 = vmatpush3.msra.mxu0 %v1709_v32  ;;  %2356 = vmatpush3.msra.mxu1 %v1709_v32 }
 0x85c   : > { %2187 = vmatprep.subr.mxu0 %v1724_v3  ;;  %2341 = vmatprep.subr.mxu1 %v1724_v3 }
 0x85d   : > { %2188 = vmatpush3.msra.mxu0 %v1708_v33  ;;  %2357 = vmatpush3.msra.mxu1 %v1708_v33 }
 0x8fe   : > { %v1589_v19 = vpop.f32.mrf.mxu1 }
 0x8ff   : > { %v3468_v18 = vadd.f32 %v1589_v19, %v1516_v35 }
 0x900   : > { %v1591_v11 = vpop.f32.mrf.mxu1 }
 0x901   : > { %v3471_v38 = vmul.f32 0.70710677, %v3468_v18  ;;  %v3473_v10 = vadd.f32 %v1591_v11, %v1520_v37 }
 0x902   : > { %v1595_v40 = vpop.f32.mrf.mxu1 }
 0x903   : > { %v1616_v34 = vand.u32 2147483647, %v3471_v38  ;;  %v3477_v36 = vmul.f32 0.70710677, %v3473_v10  ;;  %v3479_v43 = vadd.f32 %v1595_v40, %v1516_v35  ;;  %vm1608_vm3 = vcmp.ge.f32.partialorder %v3471_v38, 0.0 }
 0x904   : > { %v1597_v31 = vpop.f32.mrf.mxu1 }
 0x905   : > { %v1620_v27 = vmul.f32 0.3275911, %v1616_v34  ;;  %v1617_v30 = vand.u32 2147483647, %v3477_v36  ;;  %v3483_v39 = vmul.f32 0.70710677, %v3479_v43  ;;  %v3485_v46 = vadd.f32 %v1597_v31, %v1520_v37 }
 0x906   : > { %v1672_v45 = vsub.f32 0.0, %v1616_v34  ;;  %vm1609_vm4 = vcmp.ge.f32.partialorder %v3477_v36, 0.0  ;;  %v1601_v36 = vmul.f32 0.5, %v3473_v10 }
 0x907   : > { %v1624_v41 = vadd.f32 1.0, %v1620_v27  ;;  %v1621_v44 = vmul.f32 0.3275911, %v1617_v30  ;;  %v1618_v49 = vand.u32 2147483647, %v3483_v39  ;;  %v1673_v48 = vsub.f32 0.0, %v1617_v30 }
 0x908   : > { %v3489_v51 = vmul.f32 0.70710677, %v3485_v46  ;;  %v1676_v63 = vmul.f32 %v1672_v45, %v1616_v34  ;;  %vm1610_vm5 = vcmp.ge.f32.partialorder %v3483_v39, 0.0 }
 0x909   : > { %2542 = vrcp.f32 %v1624_v41  ;;  %v1625_v47 = vadd.f32 1.0, %v1621_v44  ;;  %v1622_v54 = vmul.f32 0.3275911, %v1618_v49  ;;  %v1674_v52 = vsub.f32 0.0, %v1618_v49 }
 0x90a   : > { %v1619_v42 = vand.u32 2147483647, %v3489_v51  ;;  %v1677_v6 = vmul.f32 %v1673_v48, %v1617_v30  ;;  %v1680_v7 = vmul.f32 1.442695, %v1676_v63  ;;  %vm1611_vm6 = vcmp.ge.f32.partialorder %v3489_v51, 0.0 }
 0x90b   : > { %2544 = vrcp.f32 %v1625_v47  ;;  %v1626_v55 = vadd.f32 1.0, %v1622_v54  ;;  %v1678_v57 = vmul.f32 %v1674_v52, %v1618_v49  ;;  %v1602_v51 = vmul.f32 0.5, %v3479_v43 }
 0x90c   : > { %v1623_v50 = vmul.f32 0.3275911, %v1619_v42  ;;  %v1675_v56 = vsub.f32 0.0, %v1619_v42  ;;  %v1682_v61 = vmul.f32 1.442695, %v1677_v6 }
 0x90d   : > { %2546 = vrcp.f32 %v1626_v55  ;;  %v1684_v13 = vmul.f32 1.442695, %v1678_v57 }
 0x90e   : > { %v1627_v60 = vadd.f32 1.0, %v1623_v50  ;;  %v1679_v16 = vmul.f32 %v1675_v56, %v1619_v42 }
 0x910   : > { %2548 = vrcp.f32 %v1627_v60  ;;  %v1686_v1 = vmul.f32 1.442695, %v1679_v16  ;;  %v2806_v60 = vmov -1.0  }
 0x911   : > { %2550 = vpow2.f32 %v1680_v7  ;;  %v1612_v48 = vsel %vm1608_vm3, 1.0, %v2806_v60  ;;  %v1613_v56 = vsel %vm1609_vm4, 1.0, %v2806_v60  ;;  %v1615_v39 = vsel %vm1611_vm6, 1.0, %v2806_v60 }
 0x912   : > { %2552 = vpow2.f32 %v1682_v61 }
 0x913   : > { %2554 = vpow2.f32 %v1684_v13  ;;  %v1600_v13 = vmul.f32 0.5, %v3468_v18 }
 0x914   : > { %2556 = vpow2.f32 %v1686_v1 }
 0x916   : > { %v2543_v0 = vpop.eup %2542 }
 0x917   : > { %v1636_v4 = vmul.f32 1.0614054, %v2543_v0 }
 0x918   : > { %v2545_v14 = vpop.eup %2544 }
 0x919   : > { %v1640_v59 = vadd.f32 -1.4531521, %v1636_v4  ;;  %v1637_v5 = vmul.f32 1.0614054, %v2545_v14 }
 0x91a   : > { %v2547_v25 = vpop.eup %2546 }
 0x91b   : > { %v1644_v29 = vmul.f32 %v2543_v0, %v1640_v59  ;;  %v1638_v9 = vmul.f32 1.0614054, %v2547_v25  ;;  %v1641_v62 = vadd.f32 -1.4531521, %v1637_v5 }
 0x91d   : > { %v1648_v20 = vadd.f32 1.4214138, %v1644_v29  ;;  %v2549_v17 = vpop.eup %2548  ;;  %v1642_v22 = vadd.f32 -1.4531521, %v1638_v9  ;;  %v1645_v2 = vmul.f32 %v2545_v14, %v1641_v62  ;;  %v1614_v29 = vsel %vm1610_vm5, 1.0, %v2806_v60 }
 0x91e   : > { %v1639_v26 = vmul.f32 1.0614054, %v2549_v17  ;;  %v2551_v30 = vpop.eup %2550 }
 0x91f   : > { %v1652_v21 = vmul.f32 %v2543_v0, %v1648_v20  ;;  %v1646_v28 = vmul.f32 %v2547_v25, %v1642_v22  ;;  %v1649_v23 = vadd.f32 1.4214138, %v1645_v2  ;;  %v2553_v55 = vpop.eup %2552 }
 0x920   : > { %v1643_v15 = vadd.f32 -1.4531521, %v1639_v26 }
 0x921   : > { %v1656_v24 = vadd.f32 -0.28449672, %v1652_v21  ;;  %v1650_v32 = vadd.f32 1.4214138, %v1646_v28  ;;  %v1653_v3 = vmul.f32 %v2545_v14, %v1649_v23  ;;  %v1603_v21 = vmul.f32 0.5, %v3485_v46 }
 0x922   : > { %v1647_v12 = vmul.f32 %v2549_v17, %v1643_v15 }
 0x923   : > { %v1660_v33 = vmul.f32 %v2543_v0, %v1656_v24  ;;  %v1654_v35 = vmul.f32 %v2547_v25, %v1650_v32  ;;  %v1657_v37 = vadd.f32 -0.28449672, %v1653_v3 }
 0x924   : > { %v1651_v11 = vadd.f32 1.4214138, %v1647_v12 }
 0x925   : > { %v1664_v19 = vadd.f32 0.2548296, %v1660_v33  ;;  %v1658_v40 = vadd.f32 -0.28449672, %v1654_v35  ;;  %v1661_v34 = vmul.f32 %v2545_v14, %v1657_v37 }
 0x926   : > { %v1655_v27 = vmul.f32 %v2549_v17, %v1651_v11 }
 0x927   : > { %v1668_v31 = vmul.f32 %v2543_v0, %v1664_v19  ;;  %v1662_v41 = vmul.f32 %v2547_v25, %v1658_v40  ;;  %v1665_v44 = vadd.f32 0.2548296, %v1661_v34  ;;  %v2555_v0 = vpop.eup %2554 }
 0x928   : > { %v1659_v47 = vadd.f32 -0.28449672, %v1655_v27  ;;  %v2557_v59 = vpop.eup %2556 }
 0x929   : > { %v1688_v49 = vmul.f32 %v2551_v30, %v1668_v31  ;;  %v1666_v54 = vadd.f32 0.2548296, %v1662_v41  ;;  %v1669_v42 = vmul.f32 %v2545_v14, %v1665_v44 }
 0x92a   : > { %v1663_v45 = vmul.f32 %v2549_v17, %v1659_v47 }
 0x92b   : > { %v1692_v50 = vsub.f32 1.0, %v1688_v49  ;;  %v1670_v63 = vmul.f32 %v2547_v25, %v1666_v54  ;;  %v1689_v52 = vmul.f32 %v2553_v55, %v1669_v42 }
 0x92c   : > { %v1667_v4 = vadd.f32 0.2548296, %v1663_v45 }
 0x92d   : > { %v1696_v6 = vmul.f32 %v1692_v50, %v1612_v48  ;;  %v1690_v7 = vmul.f32 %v2555_v0, %v1670_v63  ;;  %v1693_v38 = vsub.f32 1.0, %v1689_v52 }
 0x92e   : > { %v1671_v57 = vmul.f32 %v2549_v17, %v1667_v4 }
 0x92f   : > { %v1694_v14 = vsub.f32 1.0, %v1690_v7  ;;  %v1697_v61 = vmul.f32 %v1693_v38, %v1613_v56  ;;  %v1700_v5 = vadd.f32 1.0, %v1696_v6 }
 0x930   : > { %v1691_v16 = vmul.f32 %v2557_v59, %v1671_v57 }
 0x931   : > { %v1698_v25 = vmul.f32 %v1694_v14, %v1614_v29  ;;  %v1701_v9 = vadd.f32 1.0, %v1697_v61  ;;  %v1704_v22 = vmul.f32 %v1700_v5, %v1600_v13 }
 0x932   : > { %v1695_v62 = vsub.f32 1.0, %v1691_v16 }
 0x933   : > { %v1705_v20 = vmul.f32 %v1701_v9, %v1601_v36  ;;  %v1702_v17 = vadd.f32 1.0, %v1698_v25 }
 0x934   : > { %v1699_v2 = vmul.f32 %v1695_v62, %v1615_v39 }
 0x935   : > { %1808 = vmatprep.mubr.f32.mxu0 %v1705_v20  ;;  %v1706_v10 = vmul.f32 %v1702_v17, %v1602_v51 }
 0x936   : > { %1809 = vmatmul.mubr.f32.vlgmr.msra.gmra.mxu0 %v1704_v22  ;;  %v1703_v1 = vadd.f32 1.0, %v1699_v2 }
 0x938   : > { %v1707_v26 = vmul.f32 %v1703_v1, %v1603_v21 }
 0x93a   : > { %1813 = vmatprep.mubr.f32.mxu1 %v1707_v26 }
 0x93b   : > { %1814 = vmatmul.mubr.f32.vlgmr.msra.gmra.mxu1 %v1706_v10 }
 0x9f6   : > { %v2189_v28 = vpop.f32.mrf.mxu0 }
 0x9f8   : > { %v2190_v18 = vpop.f32.mrf.mxu0 }
 0x9f9   : > { %v2191_v23 = vadd.f32 %v2190_v18, %v2189_v28 }
 0x9fb   : > { %v1811_v24 = vadd.f32 %v2191_v23, %v3082_v8  ;;  %v2192_v15 = vpop.f32.mrf.mxu1 }
 0x9fd   : > { %v1819_v32 = vadd.f32 %v1811_v24, %v3421_v58  ;;  %v2193_v3 = vpop.f32.mrf.mxu1 }
 0x9fe   : > { %v2194_v46 = vadd.f32 %v2193_v3, %v2192_v15 }
 0x9ff   : > { %1821 = vst [vmem:[#allocation13] sm:$0xff] %v1819_v32 }
 0xa00   : > { %v1816_v43 = vadd.f32 %v2194_v46, %v3082_v8 }
 0xa02   : > { %v1820_v33 = vadd.f32 %v1816_v43, %v3428_v53 }
 0xa04   : > { %1822 = vst [vmem:[#allocation13 + $0x8] sm:$0xff] %v1820_v33 }
 0xa05   : > { %2709 = shalt.err (!%p2706_p5)
}
 0xa06   : > { %s2808_s30 = smov 128   ;;  %s2809_s26 = smov 8  }
 0xa07   : > { %s3560_s20 = sld [smem:[#allocation23_spill]] }
 0xa0d   : > { %2375 = dma.vmem_to_hbm [thread:$0]  (%p2398_p0), %s1833_s19, 256, %s3560_s20, [#allocation6], %s2808_s30, %s2808_s30, %s2809_s26  }
 0xa0e   : > { %2761 = dma.done.wait (%p2398_p0), [#allocation6], 256  }
 0xa0f   : > { %2763 = vsyncadd (%p2398_p0), [#allocation6], 4294967040 }
 0xa10 PF: > { %s27_s14 = sadd.s32 1, %s2786_s14   ;;  %s3561_s11 = sld [smem:[#allocation18_spill]] }
 0xa11   : > { %p24_p8 = scmp.ge.s32.totalorder %s27_s14, 4   ;;  %s3562_s21 = sld [smem:[#allocation20_spill]] }
 0xa12   : > { %s3563_s18 = sld [smem:[#allocation19_spill]]  ;;  %s3564_s30 = smov %s2770_s10 }
 0xa13   : > { %s3567_s12 = smov %s2782_s13 }
 0xa14   :  { %26 = sbr.rel (!%p24_p8) target bundleno = 12 (0xc), region = 170 }
 0xa16   : > { %s3565_s10 = smov %s3561_s11 }
 0xa17   : > { %s3566_s11 = smov %s3562_s21 }
 0xa18   : > { %s3568_s13 = smov %s3563_s18 }
 0xa19   :  { %1848 = vsyncpa [#allocation5], 1 }
 0xa1a   :  { %1850 = vsyncpa [#allocation5 + $0x1], 1 }
 0xa1b   :  { %1851 = vsyncpa [#allocation8], 1 }
 0xa1c   :  { %1853 = vsyncpa [#allocation8 + $0x1], 1 }
 0xa1d   :  { %1854 = vsyncpa [#allocation11], 1 }
 0xa1e   :  { %1856 = vsyncpa [#allocation11 + $0x1], 1 }
 0xa1f   :  { %1857 = vsyncpa [#allocation6], 1 }
 0xa20   :  { %1859 = vsyncpa [#allocation6 + $0x1], 1 }

</bundles_post_ra>
